<compile_context>
chip_gen: v7x
topology: tpu7x:2x2x1
jax: 0.10.0
libtpu: 0.0.40
codegen_flags: <defaults>
</compile_context>

<pallas_src>
import functools

import jax
import jax.numpy as jnp
from jax import lax
from jax.experimental import pallas as pl
from jax.experimental.pallas import tpu as pltpu

EPS = 1e-5


# ---------------------------------------------------------------------------
# Bilinear x2 upsample helpers.
# ---------------------------------------------------------------------------
def _up2_matrix(n):
    """(2n, n) operator for x2 bilinear upsample, align_corners=True (nn.Upsample)."""
    m = 2 * n
    if n == 1:
        return jnp.ones((m, n), jnp.float32)
    pos = jnp.arange(m, dtype=jnp.float32) * ((n - 1) / (m - 1))
    lo = jnp.floor(pos).astype(jnp.int32)
    hi = jnp.minimum(lo + 1, n - 1)
    frac = pos - lo.astype(jnp.float32)
    rows = jnp.arange(m)
    U = jnp.zeros((m, n), jnp.float32)
    U = U.at[rows, lo].add(1.0 - frac)
    U = U.at[rows, hi].add(frac)
    return U


def _bilinear_up2_align_corners_nchw(x):
    """Reference-only plain-JAX upsample (gather based), NCHW."""
    N, C, H, W = x.shape
    Ho, Wo = 2 * H, 2 * W

    def coords(out_size, in_size):
        if in_size == 1:
            z = jnp.zeros((out_size,), jnp.float32)
            zi = jnp.zeros((out_size,), jnp.int32)
            return z, zi, zi
        pos = jnp.arange(out_size, dtype=jnp.float32) * ((in_size - 1) / (out_size - 1))
        lo = jnp.floor(pos).astype(jnp.int32)
        hi = jnp.minimum(lo + 1, in_size - 1)
        return pos - lo.astype(jnp.float32), lo, hi

    fh, h0, h1 = coords(Ho, H)
    fw, w0, w1 = coords(Wo, W)

    xh0 = x[:, :, h0, :]
    xh1 = x[:, :, h1, :]

    def lerp_w(xr):
        a = xr[:, :, :, w0]
        b = xr[:, :, :, w1]
        return a * (1.0 - fw) + b * fw

    top = lerp_w(xh0)
    bot = lerp_w(xh1)
    return top * (1.0 - fh)[:, None] + bot * fh[:, None]


# ---------------------------------------------------------------------------
# Fused Pallas kernel. One grid step = one batch element, layout (C, H*W).
# ---------------------------------------------------------------------------
def _upblock_kernel(x_ref, fb_ref, upmT_ref, w1_ref, s1_ref, b1_ref,
                    w2_ref, s2_ref, b2_ref, ws_ref, bs_ref, o_ref, *, W2):
    f32 = jnp.float32
    HW = fb_ref.shape[2]                      # = H2 * W2

    # Fused bilinear x2 upsample: (Cin, H*W) x (H*W, H2*W2) on the MXU.
    up = jnp.dot(x_ref[0], upmT_ref[...], preferred_element_type=f32)  # (Cin, HW)

    # Fused channel concat: channels are sublanes in the (C, H*W) layout.
    cat = jnp.concatenate([up, fb_ref[0]], axis=0)                     # (Ccat, HW)

    # Lane masks killing the wrapped columns of the +/-1 horizontal taps.
    col = lax.broadcasted_iota(jnp.int32, (1, HW), 1) % W2
    m_left = (col != 0).astype(f32)           # tap kw=0 invalid where w == 0
    m_right = (col != W2 - 1).astype(f32)     # tap kw=2 invalid where w == W2-1

    def im2col_T(x):
        """(C, HW) -> (9*C, HW); rows ordered (kh, kw, c); 3x3 taps, zero-padded."""
        C = x.shape[0]
        # One zero image-row on top/bottom (H padding) plus one zero lane on each
        # end for the +/-1 column shifts; each tap is then a static lane slice.
        z = jnp.zeros((C, W2 + 1), x.dtype)
        ext = jnp.concatenate([z, x, z], axis=1)                       # (C, HW+2*W2+2)
        slabs = []
        for kh in range(3):
            for kw in range(3):
                off = kh * W2 + kw
                slab = ext[:, off:off + HW]
                if kw == 0:
                    slab = slab * m_left
                elif kw == 2:
                    slab = slab * m_right
                slabs.append(slab)
        return jnp.concatenate(slabs, axis=0)                          # (9*C, HW)

    # conv1 (3x3) as ONE MXU matmul: (Cout, 9*Ccat) x (9*Ccat, HW), f32 accumulate.
    y1 = jnp.dot(w1_ref[...], im2col_T(cat), preferred_element_type=f32)
    y1 = jnp.maximum(y1 * s1_ref[...] + b1_ref[...], 0.0)              # folded BN + ReLU

    # conv2 (3x3) as ONE MXU matmul: (Cout, 9*Cout) x (9*Cout, HW).
    y2 = jnp.dot(w2_ref[...], im2col_T(y1), preferred_element_type=f32)
    y2 = jnp.maximum(y2 * s2_ref[...] + b2_ref[...], 0.0)

    # 1x1 skip conv on the (unpadded) concat input.
    skip = jnp.dot(ws_ref[...], cat, preferred_element_type=f32) + bs_ref[...]

    # Dense (Cout, HW) store: last dim is a multiple of 128 -> unmasked vst.
    o_ref[0] = (y2 + skip).astype(o_ref.dtype)


def _upblock_pallas(x_f, fb_f, upmT, w1m, s1, b1, w2m, s2, b2, wsm, bs, *, W2):
    N, Cin, HWi = x_f.shape
    Cout, HW = fb_f.shape[1], fb_f.shape[2]
    Ccat = Cin + Cout

    kernel = functools.partial(_upblock_kernel, W2=W2)

    return pl.pallas_call(
        kernel,
        out_shape=jax.ShapeDtypeStruct((N, Cout, HW), jnp.float32),
        grid_spec=pltpu.PrefetchScalarGridSpec(
            num_scalar_prefetch=0,
            grid=(N,),
            in_specs=[
                pl.BlockSpec((1, Cin, HWi), lambda n: (n, 0, 0)),     # x (per image, low-res)
                pl.BlockSpec((1, Cout, HW), lambda n: (n, 0, 0)),     # fb (per image)
                pl.BlockSpec((HWi, HW), lambda n: (0, 0)),            # upsample operator^T
                pl.BlockSpec((Cout, 9 * Ccat), lambda n: (0, 0)),     # w1 matmul form
                pl.BlockSpec((Cout, 1), lambda n: (0, 0)),            # s1
                pl.BlockSpec((Cout, 1), lambda n: (0, 0)),            # b1
                pl.BlockSpec((Cout, 9 * Cout), lambda n: (0, 0)),     # w2 matmul form
                pl.BlockSpec((Cout, 1), lambda n: (0, 0)),            # s2
                pl.BlockSpec((Cout, 1), lambda n: (0, 0)),            # b2
                pl.BlockSpec((Cout, Ccat), lambda n: (0, 0)),         # skip weight
                pl.BlockSpec((Cout, 1), lambda n: (0, 0)),            # skip bias
            ],
            out_specs=pl.BlockSpec((1, Cout, HW), lambda n: (n, 0, 0)),
        ),
        compiler_params=pltpu.CompilerParams(dimension_semantics=("parallel",)),
    )(x_f, fb_f, upmT, w1m, s1, b1, w2m, s2, b2, wsm, bs)


# ---------------------------------------------------------------------------
# Public wrapper: NCHW in / NCHW out, like the PyTorch module. No transposes.
# ---------------------------------------------------------------------------
def upblock_forward(x_nchw, fb_nchw, p):
    x = x_nchw.astype(jnp.float32)
    fb = fb_nchw.astype(jnp.float32)
    N, Cin, H, W = x.shape
    Cout = fb.shape[1]
    H2, W2 = 2 * H, 2 * W
    HW = H2 * W2
    Ccat = Cin + Cout

    x_f = x.reshape(N, Cin, H * W)                    # free reshape (contiguous)
    fb_f = fb.reshape(N, Cout, HW)

    # Precomputed bilinear x2 operator (align_corners=True): up_flat = x_flat @ upmT.
    upmT = jnp.kron(_up2_matrix(H), _up2_matrix(W)).T  # (H*W, H2*W2)

    # Fold eval-mode BN (and conv bias) into per-channel scale / bias.
    s1 = p['g1'] / jnp.sqrt(p['rv1'] + EPS)
    be1 = p['be1'] + s1 * (p['b1'] - p['rm1'])
    s2 = p['g2'] / jnp.sqrt(p['rv2'] + EPS)
    be2 = p['be2'] + s2 * (p['b2'] - p['rm2'])

    # Pre-reshape conv weights to matmul form (Cout, 9*C), K ordered (kh, kw, cin).
    w1m = jnp.transpose(p['w1'], (3, 0, 1, 2)).reshape(Cout, 9 * Ccat)
    w2m = jnp.transpose(p['w2'], (3, 0, 1, 2)).reshape(Cout, 9 * Cout)
    wsm = jnp.transpose(p['ws'])                      # (Cout, Ccat)

    out_f = _upblock_pallas(x_f, fb_f, upmT,
                            w1m, s1[:, None], be1[:, None],
                            w2m, s2[:, None], be2[:, None],
                            wsm, p['bs'][:, None], W2=W2)
    return out_f.reshape(N, Cout, H2, W2)             # NCHW, free reshape


# ---------------------------------------------------------------------------
# Pure-JAX reference (lax.conv, NCHW) for numerical verification.
# ---------------------------------------------------------------------------
def upblock_reference(x_nchw, fb_nchw, p):
    x = x_nchw.astype(jnp.float32)
    fb = fb_nchw.astype(jnp.float32)
    up = _bilinear_up2_align_corners_nchw(x)
    cat = jnp.concatenate([up, fb], axis=1)
    dn = ('NCHW', 'HWIO', 'NCHW')

    def bn(z, g, be, rm, rv):
        return (g[None, :, None, None] * (z - rm[None, :, None, None])
                / jnp.sqrt(rv[None, :, None, None] + EPS) + be[None, :, None, None])

    z1 = lax.conv_general_dilated(cat, p['w1'], (1, 1), 'SAME',
                                  dimension_numbers=dn) + p['b1'][None, :, None, None]
    z1 = jnp.maximum(bn(z1, p['g1'], p['be1'], p['rm1'], p['rv1']), 0.0)
    z2 = lax.conv_general_dilated(z1, p['w2'], (1, 1), 'SAME',
                                  dimension_numbers=dn) + p['b2'][None, :, None, None]
    z2 = jnp.maximum(bn(z2, p['g2'], p['be2'], p['rm2'], p['rv2']), 0.0)
    sk = lax.conv_general_dilated(cat, p['ws'][None, None], (1, 1), 'SAME',
                                  dimension_numbers=dn) + p['bs'][None, :, None, None]
    return z2 + sk


def make_params(key, cin, cout):
    ccat = cin + cout
    ks = jax.random.split(key, 12)
    p = {
        'w1': 0.1 * jax.random.normal(ks[0], (3, 3, ccat, cout), jnp.float32),
        'b1': 0.1 * jax.random.normal(ks[1], (cout,), jnp.float32),
        'g1': 1.0 + 0.1 * jax.random.normal(ks[2], (cout,), jnp.float32),
        'be1': 0.1 * jax.random.normal(ks[3], (cout,), jnp.float32),
        'rm1': 0.1 * jax.random.normal(ks[4], (cout,), jnp.float32),
        'rv1': 0.5 + jnp.abs(jax.random.normal(ks[5], (cout,), jnp.float32)),
        'w2': 0.1 * jax.random.normal(ks[6], (3, 3, cout, cout), jnp.float32),
        'b2': 0.1 * jax.random.normal(ks[7], (cout,), jnp.float32),
        'g2': 1.0 + 0.1 * jax.random.normal(ks[8], (cout,), jnp.float32),
        'be2': 0.1 * jax.random.normal(ks[9], (cout,), jnp.float32),
        'rm2': 0.1 * jax.random.normal(ks[10], (cout,), jnp.float32),
        'rv2': 0.5 + jnp.abs(jax.random.normal(ks[11], (cout,), jnp.float32)),
    }
    k_ws, k_bs = jax.random.split(ks[0])
    p['ws'] = 0.1 * jax.random.normal(k_ws, (ccat, cout), jnp.float32)
    p['bs'] = 0.1 * jax.random.normal(k_bs, (cout,), jnp.float32)
    return p


if __name__ == "__main__":
    # Small shapes consistent with the module: UpBlock(in_channel=16, out_channel=8).
    N, CIN, COUT, H, W = 2, 16, 8, 8, 8
    key = jax.random.PRNGKey(0)
    k_x, k_fb, k_p = jax.random.split(key, 3)

    x = jax.random.normal(k_x, (N, CIN, H, W), jnp.float32)             # `input` (NCHW)
    fb = jax.random.normal(k_fb, (N, COUT, 2 * H, 2 * W), jnp.float32)  # `FB_in` (NCHW)
    params = make_params(k_p, CIN, COUT)

    out = jax.block_until_ready(upblock_forward(x, fb, params))
    ref = jax.block_until_ready(upblock_reference(x, fb, params))

    assert out.shape == (N, COUT, 2 * H, 2 * W), out.shape
    err = float(jnp.max(jnp.abs(out - ref)))
    assert jnp.allclose(out, ref, rtol=1e-3, atol=1e-3), err

    print("KERNEL_OK")
</pallas_src>

<mosaic_0001>
module attributes {stable_mosaic.version = 11 : i64} {
  func.func @_upblock_kernel(%arg0: i32, %arg1: memref<1x16x64xf32, #tpu.memory_space<vmem>>, %arg2: memref<1x8x256xf32, #tpu.memory_space<vmem>>, %arg3: memref<64x256xf32, #tpu.memory_space<vmem>>, %arg4: memref<8x216xf32, #tpu.memory_space<vmem>>, %arg5: memref<8x1xf32, #tpu.memory_space<vmem>>, %arg6: memref<8x1xf32, #tpu.memory_space<vmem>>, %arg7: memref<8x72xf32, #tpu.memory_space<vmem>>, %arg8: memref<8x1xf32, #tpu.memory_space<vmem>>, %arg9: memref<8x1xf32, #tpu.memory_space<vmem>>, %arg10: memref<8x24xf32, #tpu.memory_space<vmem>>, %arg11: memref<8x1xf32, #tpu.memory_space<vmem>>, %arg12: memref<1x8x256xf32, #tpu.memory_space<vmem>>) attributes {dimension_semantics = [#tpu.dimension_semantics<parallel>], iteration_bounds = array<i64: 2>, scalar_prefetch = 0 : i64, scratch_operands = 0 : i64, tpu.core_type = #tpu.core_type<tc>, window_params = [{transform_indices = @transform_0, window_bounds = array<i64: 1, 16, 64>}, {transform_indices = @transform_1, window_bounds = array<i64: 1, 8, 256>}, {pipeline_mode = #tpu.pipeline_mode<synchronous>, transform_indices = @transform_2, window_bounds = array<i64: 64, 256>}, {pipeline_mode = #tpu.pipeline_mode<synchronous>, transform_indices = @transform_3, window_bounds = array<i64: 8, 216>}, {pipeline_mode = #tpu.pipeline_mode<synchronous>, transform_indices = @transform_4, window_bounds = array<i64: 8, 1>}, {pipeline_mode = #tpu.pipeline_mode<synchronous>, transform_indices = @transform_5, window_bounds = array<i64: 8, 1>}, {pipeline_mode = #tpu.pipeline_mode<synchronous>, transform_indices = @transform_6, window_bounds = array<i64: 8, 72>}, {pipeline_mode = #tpu.pipeline_mode<synchronous>, transform_indices = @transform_7, window_bounds = array<i64: 8, 1>}, {pipeline_mode = #tpu.pipeline_mode<synchronous>, transform_indices = @transform_8, window_bounds = array<i64: 8, 1>}, {pipeline_mode = #tpu.pipeline_mode<synchronous>, transform_indices = @transform_9, window_bounds = array<i64: 8, 24>}, {pipeline_mode = #tpu.pipeline_mode<synchronous>, transform_indices = @transform_10, window_bounds = array<i64: 8, 1>}, {transform_indices = @transform_11, window_bounds = array<i64: 1, 8, 256>}]} {
    %c0 = arith.constant 0 : index
    %c0_0 = arith.constant 0 : index
    %c0_1 = arith.constant 0 : index
    %0 = vector.load %arg1[%c0, %c0_0, %c0_1] : memref<1x16x64xf32, #tpu.memory_space<vmem>>, vector<1x16x64xf32>
    %1 = vector.shape_cast %0 : vector<1x16x64xf32> to vector<16x64xf32>
    %c0_2 = arith.constant 0 : index
    %c0_3 = arith.constant 0 : index
    %2 = vector.load %arg3[%c0_2, %c0_3] : memref<64x256xf32, #tpu.memory_space<vmem>>, vector<64x256xf32>
    %cst = arith.constant dense<0.000000e+00> : vector<16x256xf32>
    %3 = tpu.matmul %1, %2, %cst {dimension_numbers = #tpu.dot_dimension_numbers<[1], [0], [0], [1], [0, 0, 1, 1], [], []>} : vector<16x64xf32>, vector<64x256xf32>, vector<16x256xf32> -> vector<16x256xf32>
    %c0_4 = arith.constant 0 : index
    %c0_5 = arith.constant 0 : index
    %c0_6 = arith.constant 0 : index
    %4 = vector.load %arg2[%c0_4, %c0_5, %c0_6] : memref<1x8x256xf32, #tpu.memory_space<vmem>>, vector<1x8x256xf32>
    %5 = vector.shape_cast %4 : vector<1x8x256xf32> to vector<8x256xf32>
    %6 = tpu.concatenate %3, %5 in 0 : vector<16x256xf32>, vector<8x256xf32> -> vector<24x256xf32>
    %7 = tpu.iota {dimensions = array<i32: 1>} : vector<1x256xi32>
    %c16_i32 = arith.constant 16 : i32
    %c0_i32 = arith.constant 0 : i32
    %8 = arith.cmpi eq, %c16_i32, %c0_i32 : i32
    %c1_i32 = arith.constant 1 : i32
    %9 = arith.select %8, %c1_i32, %c16_i32 : i32
    %10 = vector.broadcast %9 : i32 to vector<1x256xi32>
    %11 = arith.remsi %7, %10 : vector<1x256xi32>
    %c0_i32_7 = arith.constant 0 : i32
    %12 = vector.broadcast %c0_i32_7 : i32 to vector<1x256xi32>
    %13 = arith.cmpi ne, %11, %12 : vector<1x256xi32>
    %c0_i32_8 = arith.constant 0 : i32
    %14 = vector.broadcast %c0_i32_8 : i32 to vector<1x256xi32>
    %15 = arith.cmpi slt, %11, %14 : vector<1x256xi32>
    %c0_i32_9 = arith.constant 0 : i32
    %16 = arith.cmpi slt, %9, %c0_i32_9 : i32
    %17 = vector.broadcast %16 : i1 to vector<1x256xi1>
    %18 = vector.broadcast %17 : vector<1x256xi1> to vector<1x256xi1>
    %19 = arith.xori %15, %18 : vector<1x256xi1>
    %20 = arith.andi %19, %13 : vector<1x256xi1>
    %21 = vector.broadcast %9 : i32 to vector<1x256xi32>
    %22 = arith.addi %11, %21 : vector<1x256xi32>
    %23 = arith.select %20, %22, %11 : vector<1x256xi1>, vector<1x256xi32>
    %c0_i32_10 = arith.constant 0 : i32
    %24 = vector.broadcast %c0_i32_10 : i32 to vector<1x256xi32>
    %25 = arith.cmpi ne, %23, %24 : vector<1x256xi32>
    %26 = arith.extui %25 : vector<1x256xi1> to vector<1x256xi32>
    %27 = arith.sitofp %26 : vector<1x256xi32> to vector<1x256xf32>
    %c15_i32 = arith.constant 15 : i32
    %28 = vector.broadcast %c15_i32 : i32 to vector<1x256xi32>
    %29 = arith.cmpi ne, %23, %28 : vector<1x256xi32>
    %30 = arith.extui %29 : vector<1x256xi1> to vector<1x256xi32>
    %31 = arith.sitofp %30 : vector<1x256xi32> to vector<1x256xf32>
    %c0_11 = arith.constant 0 : index
    %c0_12 = arith.constant 0 : index
    %32 = vector.load %arg4[%c0_11, %c0_12] : memref<8x216xf32, #tpu.memory_space<vmem>>, vector<8x216xf32>
    %cst_13 = arith.constant 0.000000e+00 : f32
    %33 = vector.broadcast %cst_13 : f32 to vector<24x17xf32>
    %34 = tpu.concatenate %33, %6, %33 in 1 : vector<24x17xf32>, vector<24x256xf32>, vector<24x17xf32> -> vector<24x290xf32>
    %35 = vector.extract_strided_slice %34 {offsets = [0, 0], sizes = [24, 256], strides = [1, 1]} : vector<24x290xf32> to vector<24x256xf32>
    %36 = vector.broadcast %27 : vector<1x256xf32> to vector<24x256xf32>
    %37 = arith.mulf %35, %36 : vector<24x256xf32>
    %38 = vector.extract_strided_slice %34 {offsets = [0, 1], sizes = [24, 256], strides = [1, 1]} : vector<24x290xf32> to vector<24x256xf32>
    %39 = vector.extract_strided_slice %34 {offsets = [0, 2], sizes = [24, 256], strides = [1, 1]} : vector<24x290xf32> to vector<24x256xf32>
    %40 = vector.broadcast %31 : vector<1x256xf32> to vector<24x256xf32>
    %41 = arith.mulf %39, %40 : vector<24x256xf32>
    %42 = vector.extract_strided_slice %34 {offsets = [0, 16], sizes = [24, 256], strides = [1, 1]} : vector<24x290xf32> to vector<24x256xf32>
    %43 = vector.broadcast %27 : vector<1x256xf32> to vector<24x256xf32>
    %44 = arith.mulf %42, %43 : vector<24x256xf32>
    %45 = vector.extract_strided_slice %34 {offsets = [0, 17], sizes = [24, 256], strides = [1, 1]} : vector<24x290xf32> to vector<24x256xf32>
    %46 = vector.extract_strided_slice %34 {offsets = [0, 18], sizes = [24, 256], strides = [1, 1]} : vector<24x290xf32> to vector<24x256xf32>
    %47 = vector.broadcast %31 : vector<1x256xf32> to vector<24x256xf32>
    %48 = arith.mulf %46, %47 : vector<24x256xf32>
    %49 = vector.extract_strided_slice %34 {offsets = [0, 32], sizes = [24, 256], strides = [1, 1]} : vector<24x290xf32> to vector<24x256xf32>
    %50 = vector.broadcast %27 : vector<1x256xf32> to vector<24x256xf32>
    %51 = arith.mulf %49, %50 : vector<24x256xf32>
    %52 = vector.extract_strided_slice %34 {offsets = [0, 33], sizes = [24, 256], strides = [1, 1]} : vector<24x290xf32> to vector<24x256xf32>
    %53 = vector.extract_strided_slice %34 {offsets = [0, 34], sizes = [24, 256], strides = [1, 1]} : vector<24x290xf32> to vector<24x256xf32>
    %54 = vector.broadcast %31 : vector<1x256xf32> to vector<24x256xf32>
    %55 = arith.mulf %53, %54 : vector<24x256xf32>
    %56 = tpu.concatenate %37, %38, %41, %44, %45, %48, %51, %52, %55 in 0 : vector<24x256xf32>, vector<24x256xf32>, vector<24x256xf32>, vector<24x256xf32>, vector<24x256xf32>, vector<24x256xf32>, vector<24x256xf32>, vector<24x256xf32>, vector<24x256xf32> -> vector<216x256xf32>
    %cst_14 = arith.constant dense<0.000000e+00> : vector<8x256xf32>
    %57 = tpu.matmul %32, %56, %cst_14 {dimension_numbers = #tpu.dot_dimension_numbers<[1], [0], [0], [1], [0, 0, 1, 1], [], []>} : vector<8x216xf32>, vector<216x256xf32>, vector<8x256xf32> -> vector<8x256xf32>
    %c0_15 = arith.constant 0 : index
    %c0_16 = arith.constant 0 : index
    %58 = vector.load %arg5[%c0_15, %c0_16] : memref<8x1xf32, #tpu.memory_space<vmem>>, vector<8x1xf32>
    %59 = vector.broadcast %58 : vector<8x1xf32> to vector<8x256xf32>
    %60 = arith.mulf %57, %59 : vector<8x256xf32>
    %c0_17 = arith.constant 0 : index
    %c0_18 = arith.constant 0 : index
    %61 = vector.load %arg6[%c0_17, %c0_18] : memref<8x1xf32, #tpu.memory_space<vmem>>, vector<8x1xf32>
    %62 = vector.broadcast %61 : vector<8x1xf32> to vector<8x256xf32>
    %63 = arith.addf %60, %62 : vector<8x256xf32>
    %cst_19 = arith.constant 0.000000e+00 : f32
    %64 = vector.broadcast %cst_19 : f32 to vector<8x256xf32>
    %65 = arith.maximumf %63, %64 : vector<8x256xf32>
    %c0_20 = arith.constant 0 : index
    %c0_21 = arith.constant 0 : index
    %66 = vector.load %arg7[%c0_20, %c0_21] : memref<8x72xf32, #tpu.memory_space<vmem>>, vector<8x72xf32>
    %cst_22 = arith.constant 0.000000e+00 : f32
    %67 = vector.broadcast %cst_22 : f32 to vector<8x17xf32>
    %68 = tpu.concatenate %67, %65, %67 in 1 : vector<8x17xf32>, vector<8x256xf32>, vector<8x17xf32> -> vector<8x290xf32>
    %69 = vector.extract_strided_slice %68 {offsets = [0, 0], sizes = [8, 256], strides = [1, 1]} : vector<8x290xf32> to vector<8x256xf32>
    %70 = vector.broadcast %27 : vector<1x256xf32> to vector<8x256xf32>
    %71 = arith.mulf %69, %70 : vector<8x256xf32>
    %72 = vector.extract_strided_slice %68 {offsets = [0, 1], sizes = [8, 256], strides = [1, 1]} : vector<8x290xf32> to vector<8x256xf32>
    %73 = vector.extract_strided_slice %68 {offsets = [0, 2], sizes = [8, 256], strides = [1, 1]} : vector<8x290xf32> to vector<8x256xf32>
    %74 = vector.broadcast %31 : vector<1x256xf32> to vector<8x256xf32>
    %75 = arith.mulf %73, %74 : vector<8x256xf32>
    %76 = vector.extract_strided_slice %68 {offsets = [0, 16], sizes = [8, 256], strides = [1, 1]} : vector<8x290xf32> to vector<8x256xf32>
    %77 = vector.broadcast %27 : vector<1x256xf32> to vector<8x256xf32>
    %78 = arith.mulf %76, %77 : vector<8x256xf32>
    %79 = vector.extract_strided_slice %68 {offsets = [0, 17], sizes = [8, 256], strides = [1, 1]} : vector<8x290xf32> to vector<8x256xf32>
    %80 = vector.extract_strided_slice %68 {offsets = [0, 18], sizes = [8, 256], strides = [1, 1]} : vector<8x290xf32> to vector<8x256xf32>
    %81 = vector.broadcast %31 : vector<1x256xf32> to vector<8x256xf32>
    %82 = arith.mulf %80, %81 : vector<8x256xf32>
    %83 = vector.extract_strided_slice %68 {offsets = [0, 32], sizes = [8, 256], strides = [1, 1]} : vector<8x290xf32> to vector<8x256xf32>
    %84 = vector.broadcast %27 : vector<1x256xf32> to vector<8x256xf32>
    %85 = arith.mulf %83, %84 : vector<8x256xf32>
    %86 = vector.extract_strided_slice %68 {offsets = [0, 33], sizes = [8, 256], strides = [1, 1]} : vector<8x290xf32> to vector<8x256xf32>
    %87 = vector.extract_strided_slice %68 {offsets = [0, 34], sizes = [8, 256], strides = [1, 1]} : vector<8x290xf32> to vector<8x256xf32>
    %88 = vector.broadcast %31 : vector<1x256xf32> to vector<8x256xf32>
    %89 = arith.mulf %87, %88 : vector<8x256xf32>
    %90 = tpu.concatenate %71, %72, %75, %78, %79, %82, %85, %86, %89 in 0 : vector<8x256xf32>, vector<8x256xf32>, vector<8x256xf32>, vector<8x256xf32>, vector<8x256xf32>, vector<8x256xf32>, vector<8x256xf32>, vector<8x256xf32>, vector<8x256xf32> -> vector<72x256xf32>
    %cst_23 = arith.constant dense<0.000000e+00> : vector<8x256xf32>
    %91 = tpu.matmul %66, %90, %cst_23 {dimension_numbers = #tpu.dot_dimension_numbers<[1], [0], [0], [1], [0, 0, 1, 1], [], []>} : vector<8x72xf32>, vector<72x256xf32>, vector<8x256xf32> -> vector<8x256xf32>
    %c0_24 = arith.constant 0 : index
    %c0_25 = arith.constant 0 : index
    %92 = vector.load %arg8[%c0_24, %c0_25] : memref<8x1xf32, #tpu.memory_space<vmem>>, vector<8x1xf32>
    %93 = vector.broadcast %92 : vector<8x1xf32> to vector<8x256xf32>
    %94 = arith.mulf %91, %93 : vector<8x256xf32>
    %c0_26 = arith.constant 0 : index
    %c0_27 = arith.constant 0 : index
    %95 = vector.load %arg9[%c0_26, %c0_27] : memref<8x1xf32, #tpu.memory_space<vmem>>, vector<8x1xf32>
    %96 = vector.broadcast %95 : vector<8x1xf32> to vector<8x256xf32>
    %97 = arith.addf %94, %96 : vector<8x256xf32>
    %cst_28 = arith.constant 0.000000e+00 : f32
    %98 = vector.broadcast %cst_28 : f32 to vector<8x256xf32>
    %99 = arith.maximumf %97, %98 : vector<8x256xf32>
    %c0_29 = arith.constant 0 : index
    %c0_30 = arith.constant 0 : index
    %100 = vector.load %arg10[%c0_29, %c0_30] : memref<8x24xf32, #tpu.memory_space<vmem>>, vector<8x24xf32>
    %cst_31 = arith.constant dense<0.000000e+00> : vector<8x256xf32>
    %101 = tpu.matmul %100, %6, %cst_31 {dimension_numbers = #tpu.dot_dimension_numbers<[1], [0], [0], [1], [0, 0, 1, 1], [], []>} : vector<8x24xf32>, vector<24x256xf32>, vector<8x256xf32> -> vector<8x256xf32>
    %c0_32 = arith.constant 0 : index
    %c0_33 = arith.constant 0 : index
    %102 = vector.load %arg11[%c0_32, %c0_33] : memref<8x1xf32, #tpu.memory_space<vmem>>, vector<8x1xf32>
    %103 = vector.broadcast %102 : vector<8x1xf32> to vector<8x256xf32>
    %104 = arith.addf %101, %103 : vector<8x256xf32>
    %105 = arith.addf %99, %104 : vector<8x256xf32>
    %c0_34 = arith.constant 0 : index
    %c0_35 = arith.constant 0 : index
    %c0_36 = arith.constant 0 : index
    %106 = vector.load %arg12[%c0_34, %c0_35, %c0_36] : memref<1x8x256xf32, #tpu.memory_space<vmem>>, vector<1x8x256xf32>
    %107 = vector.shape_cast %106 : vector<1x8x256xf32> to vector<8x256xf32>
    %108 = vector.shape_cast %105 : vector<8x256xf32> to vector<1x8x256xf32>
    tpu.vector_store %arg12[%c0_34, %c0_35, %c0_36], %108 {strides = array<i32>} : memref<1x8x256xf32, #tpu.memory_space<vmem>>, vector<1x8x256xf32>,
    return
  }
  func.func @transform_0(%arg0: i32) -> (i32, i32, i32) {
    %c0_i32 = arith.constant 0 : i32
    %c0_i32_0 = arith.constant 0 : i32
    %c0_i32_1 = arith.constant 0 : i32
    return %arg0, %c0_i32, %c0_i32_0 : i32, i32, i32
  }
  func.func @transform_1(%arg0: i32) -> (i32, i32, i32) {
    %c0_i32 = arith.constant 0 : i32
    %c0_i32_0 = arith.constant 0 : i32
    %c0_i32_1 = arith.constant 0 : i32
    return %arg0, %c0_i32, %c0_i32_0 : i32, i32, i32
  }
  func.func @transform_2(%arg0: i32) -> (i32, i32) {
    %c0_i32 = arith.constant 0 : i32
    %c0_i32_0 = arith.constant 0 : i32
    %c0_i32_1 = arith.constant 0 : i32
    return %c0_i32, %c0_i32_0 : i32, i32
  }
  func.func @transform_3(%arg0: i32) -> (i32, i32) {
    %c0_i32 = arith.constant 0 : i32
    %c0_i32_0 = arith.constant 0 : i32
    %c0_i32_1 = arith.constant 0 : i32
    return %c0_i32, %c0_i32_0 : i32, i32
  }
  func.func @transform_4(%arg0: i32) -> (i32, i32) {
    %c0_i32 = arith.constant 0 : i32
    %c0_i32_0 = arith.constant 0 : i32
    %c0_i32_1 = arith.constant 0 : i32
    return %c0_i32, %c0_i32_0 : i32, i32
  }
  func.func @transform_5(%arg0: i32) -> (i32, i32) {
    %c0_i32 = arith.constant 0 : i32
    %c0_i32_0 = arith.constant 0 : i32
    %c0_i32_1 = arith.constant 0 : i32
    return %c0_i32, %c0_i32_0 : i32, i32
  }
  func.func @transform_6(%arg0: i32) -> (i32, i32) {
    %c0_i32 = arith.constant 0 : i32
    %c0_i32_0 = arith.constant 0 : i32
    %c0_i32_1 = arith.constant 0 : i32
    return %c0_i32, %c0_i32_0 : i32, i32
  }
  func.func @transform_7(%arg0: i32) -> (i32, i32) {
    %c0_i32 = arith.constant 0 : i32
    %c0_i32_0 = arith.constant 0 : i32
    %c0_i32_1 = arith.constant 0 : i32
    return %c0_i32, %c0_i32_0 : i32, i32
  }
  func.func @transform_8(%arg0: i32) -> (i32, i32) {
    %c0_i32 = arith.constant 0 : i32
    %c0_i32_0 = arith.constant 0 : i32
    %c0_i32_1 = arith.constant 0 : i32
    return %c0_i32, %c0_i32_0 : i32, i32
  }
  func.func @transform_9(%arg0: i32) -> (i32, i32) {
    %c0_i32 = arith.constant 0 : i32
    %c0_i32_0 = arith.constant 0 : i32
    %c0_i32_1 = arith.constant 0 : i32
    return %c0_i32, %c0_i32_0 : i32, i32
  }
  func.func @transform_10(%arg0: i32) -> (i32, i32) {
    %c0_i32 = arith.constant 0 : i32
    %c0_i32_0 = arith.constant 0 : i32
    %c0_i32_1 = arith.constant 0 : i32
    return %c0_i32, %c0_i32_0 : i32, i32
  }
  func.func @transform_11(%arg0: i32) -> (i32, i32, i32) {
    %c0_i32 = arith.constant 0 : i32
    %c0_i32_0 = arith.constant 0 : i32
    %c0_i32_1 = arith.constant 0 : i32
    return %arg0, %c0_i32, %c0_i32_0 : i32, i32, i32
  }
}

</mosaic_0001>

<bundles_post_ra>
// kernel: tpu_custom_call.1
= control target key start
LH: loop header
LB: loop body
LE: loop exit
PB: predicated region body
PF: predicated region fallthrough
CT: control target
= control target key end

     0   :  { %s2848_s0 = inlined_call_operand.vmem [shape: f32[2,16,64], index: 0, kind: input, shape index: {}]   ;;  %s2849_s1 = inlined_call_operand.hbm [shape: f32[2,8,256], index: 1, kind: input, shape index: {}]   ;;  %s2850_s2 = inlined_call_operand.hbm [shape: f32[64,256], index: 2, kind: input, shape index: {}]   ;;  %s2851_s3 = inlined_call_operand.vmem [shape: f32[8,216], index: 3, kind: input, shape index: {}]   ;;  %s2852_s4 = inlined_call_operand.vmem [shape: f32[8,1], index: 4, kind: input, shape index: {}]   ;;  %s2853_s5 = inlined_call_operand.vmem [shape: f32[8,1], index: 5, kind: input, shape index: {}]   ;;  %s2854_s6 = inlined_call_operand.vmem [shape: f32[8,72], index: 6, kind: input, shape index: {}]   ;;  %s2855_s7 = inlined_call_operand.vmem [shape: f32[8,1], index: 7, kind: input, shape index: {}]   ;;  %s2856_s8 = inlined_call_operand.vmem [shape: f32[8,1], index: 8, kind: input, shape index: {}]   ;;  %s2857_s9 = inlined_call_operand.vmem [shape: f32[8,24], index: 9, kind: input, shape index: {}]   ;;  %s2858_s10 = inlined_call_operand.vmem [shape: f32[8,1], index: 10, kind: input, shape index: {}]   ;;  %s2859_s11 = inlined_call_operand.hbm [shape: f32[2,8,256], index: 11, kind: output, shape index: {}]  }
   0x1   :  { %2871 = sst [smem:[#allocation14_spill]] %s2859_s11 }
   0x2   :  { %16 = vsyncpa [#allocation3], 0 }
   0x3   :  { %18 = vsyncpa [#allocation3 + $0x1], 0 }
   0x4   :  { %19 = vsyncpa [#allocation6], 0 }
   0x5   :  { %20 = vsyncpa [#allocation4], 0 }
   0x6   :  { %22 = vsyncpa [#allocation4 + $0x1], 0  ;;  %s2148_s17 = smov 0   ;;  %s2150_s18 = smov 0  }
   0x7   :  { %s2152_s19 = smov 0   ;;  %s2154_s20 = smov 0  }
   0x8 LB: > { %2872 = sst [smem:[#allocation11_spill]] %s2053_s17  ;;  %s2169_s21 = sadd.s32 4294967295, %s2065_s20   ;;  %s2065_s20 = sphi %s2154_s20, %s2893_s20   ;;  %s2061_s19 = sphi %s2152_s19, %s2896_s19   ;;  %s2057_s18 = sphi %s2150_s18, %s2895_s18   ;;  %s2053_s17 = sphi %s2148_s17, %s2894_s17  }
   0x9   : > { %s1525_s22 = sadd.s32 4294967294, %s2065_s20   ;;  %p74_p0 = scmp.ne.s32.totalorder %s2057_s18, %s2053_s17 }
   0xa   : > { %p2863_p1 = scmp.eq.s32.totalorder %s2169_s21, 0  ;;  %p293_p3 = scmp.eq.s32.totalorder %s1525_s22, 1 }
   0xb   : > { %p1526_p5 = scmp.ge.s32.totalorder %s2065_s20, 1  ;;  %p300_p7 = scmp.lt.s32.totalorder %s2065_s20, 3 }
   0xc   : > { %p2178_p4 = por %p2863_p1, %p74_p0  ;;  %p2183_p6 = por %p293_p3, %p74_p0 }
   0xd   : > { %p2188_p8 = pnand %p1526_p5, %p300_p7  ;;  %s2067_s26 = smov [#allocation5]  }
   0xe   : > { %s2873_s23 = scalar_select %p2178_p4, 1, 0 }
   0xf   : > { %s2874_s24 = scalar_select %p2183_p6, 1, 0 }
  0x10   : > { %s2876_s25 = scalar_select %p2188_p8, 1, 0 }
  0x11   : > { %2875 = sst [smem:[#allocation12_spill]] %s2874_s24  ;;  %s312_s27 = sshll.u32 %s2067_s26, 4  ;;  %s2192_s27 = int_to_ptr.vmem [resolvable:$true] %s312_s27 }
  0x12   : > { %p1651_p9 = pneg %p2188_p8  ;;  %s2204_s29 = sadd.s32 1, %s2065_s20  }
  0x13   : > { %2878 = sst [smem:[#allocation13_spill]] %s2204_s29  ;;  %s61_s30 = sadd.s32 1, %s2061_s19 }
  0x14   : > { %p2199_p11 = pnand %p1651_p9, %p2863_p1  ;;  %s58_s12 = ssub.s32 %s2065_s20, %s2204_s29 }
  0x15   : > { %s1937_s15 = scalar_lea.hbm %s2850_s2, 2048 }
  0x16   : > { %p1938_p12 = scmp.ne.s32.totalorder %s2850_s2, %s1937_s15  ;;  %p1939_p13 = pneg %p2199_p11 }
  0x17   : > { %p1944_p5 = scmp.lt.u32.totalorder %s1937_s15, %s2850_s2 }
  0x18   : > { %p1940_p0 = pnand %p1939_p13, %p1938_p12 }
  0x1a   : > { %p1941_p3 = pneg %p1940_p0 }
  0x1c   : > { %p1946_p7 = pnand %p1944_p5, %p1941_p3 }
  0x1e   : > { %1949 = shalt.err (!%p1946_p7)
}
  0x1f   : > { %s1950_s29 = scalar_lea.vmem %s2192_s27, 2048  ;;  %p1958_p2 = scmp.lt.s32.totalorder %s2192_s27, %s2192_s27 }
  0x20   : > { %p1951_p9 = scmp.ne.s32.totalorder %s2192_s27, %s1950_s29  ;;  %p1959_p6 = scmp.lt.s32.totalorder %s1950_s29, %s1950_s29 }
  0x22   : > { %p1953_p10 = pnand %p1951_p9, %p1939_p13  ;;  %p1960_p4 = por %p1959_p6, %p1958_p2 }
  0x24   : > { %p1954_p1 = pneg %p1953_p10 }
  0x26   : > { %p1961_p8 = pnand %p1960_p4, %p1954_p1 }
  0x28   : > { %1964 = shalt.err (!%p1961_p8)
}
  0x29   : > { %s2068_s13 = smov 256   ;;  %s2069_s24 = smov 16  }
  0x2a   : > { %1654 = dma.hbm_to_vmem [thread:$0]  (!%p2199_p11), %s2850_s2, 2048, %s2192_s27, [#allocation6], %s2068_s13, %s2068_s13, %s2069_s24  }
  0x2b   : > { %p59_p2 = scmp.eq.s32.totalorder %s58_s12, 0  ;;  %p68_p1 = scmp.ne.s32.totalorder %s2061_s19, %s2057_s18 }
  0x2c   : > { %p69_p4 = scmp.eq.s32.totalorder %s2065_s20, 0  ;;  %p1664_p6 = scmp.lt.s32.totalorder %s2065_s20, 2 }
  0x2d   : > { %s2235_s29 = scalar_select %p59_p2, %s2061_s19, %s61_s30  }
  0x2e   : > { %p70_p8 = por %p69_p4, %p68_p1  ;;  %p2879_p10 = scmp.eq.s32.totalorder %s2169_s21, 1 }
  0x2f   : > { %s358_s22 = sand.u32 1, %s2061_s19   ;;  %s1552_s26 = sshll.u32 %s2065_s20, 8 }
  0x30   : > { %p2239_p12 = por %p2879_p10, %p68_p1  ;;  %s1529_s17 = sshll.u32 %s358_s22, 4 }
  0x31   : > { %s2248_s14 = scalar_lea.hbm %s2849_s1, %s1552_s26  ;;  %s362_s27 = scalar_lea.vmem [#allocation2], %s1529_s17 }
  0x32   : > { %s370_s30 = sshll.u32 %s362_s27, 4  ;;  %p2250_p11 = pnand %p1664_p6, %p70_p8  ;;  %s2254_s30 = int_to_ptr.vmem [resolvable:$true] %s370_s30 }
  0x33   : > { %s359_s13 = scalar_lea.sflag [#allocation3], %s358_s22  ;;  %s1965_s24 = scalar_lea.hbm %s2248_s14, 256 }
  0x34   : > { %p1966_p13 = scmp.ne.s32.totalorder %s2248_s14, %s1965_s24  ;;  %p1967_p0 = pneg %p2250_p11 }
  0x35   : > { %s1970_s15 = scalar_lea.hbm %s2849_s1, 512  ;;  %p1971_p7 = scmp.lt.u32.totalorder %s2248_s14, %s2849_s1 }
  0x36   : > { %p1968_p3 = pnand %p1967_p0, %p1966_p13  ;;  %p1972_p9 = scmp.lt.u32.totalorder %s1970_s15, %s1965_s24 }
  0x37   : > { %p1974_p1 = scmp.lt.u32.totalorder %s1965_s24, %s2248_s14 }
  0x38   : > { %p1969_p5 = pneg %p1968_p3  ;;  %p1973_p2 = por %p1972_p9, %p1971_p7 }
  0x3a   : > { %p1975_p4 = por %p1974_p1, %p1973_p2 }
  0x3c   : > { %p1976_p6 = pnand %p1975_p4, %p1969_p5 }
  0x3e   : > { %1979 = shalt.err (!%p1976_p6)
}
  0x3f   : > { %s1980_s22 = scalar_lea.vmem %s2254_s30, 256  ;;  %s2070_s27 = smov [#allocation2]  }
  0x40   : > { %p1981_p8 = scmp.ne.s32.totalorder %s2254_s30, %s1980_s22  ;;  %s1985_s11 = sshll.u32 %s2070_s27, 4  ;;  %s1986_s11 = int_to_ptr.vmem [resolvable:$false] %s1985_s11 }
  0x41   : > { %s1987_s17 = scalar_lea.vmem %s1986_s11, 512  ;;  %p1988_p3 = scmp.lt.s32.totalorder %s2254_s30, %s1986_s11 }
  0x42   : > { %p1983_p10 = pnand %p1981_p8, %p1967_p0  ;;  %p1989_p7 = scmp.lt.s32.totalorder %s1987_s17, %s1980_s22 }
  0x44   : > { %p1984_p13 = pneg %p1983_p10  ;;  %p1990_p9 = por %p1989_p7, %p1988_p3 }
  0x46   : > { %p1991_p2 = pnand %p1990_p9, %p1984_p13 }
  0x48   : > { %1994 = shalt.err (!%p1991_p2)
}
  0x49   : > { %1658 = dma.hbm_to_vmem [thread:$0]  (!%p2250_p11), %s2248_s14, 256, %s2254_s30, %s359_s13  }
  0x4a   : > { %p2882_p5 = scmp.ne.s32.totalorder %s2876_s25, 0 }
  0x4b   : > { %s2284_s24 = sand.u32 (!%p2882_p5), 1, %s2057_s18   ;;  %p2883_p0 = scmp.ne.s32.totalorder (!%p2882_p5), %s2873_s23, 0 }
  0x4c   : > { %379 = sbr.rel (%p2882_p5) target bundleno = 1367 (0x557), region = 64  ;;  %s2868_s15 = sshll.u32 (!%p2882_p5), %s2284_s24, 4 }
  0x4d   : > { %s382_s26 = scalar_lea.sflag (!%p2882_p5), [#allocation3], %s2284_s24  ;;  %s2290_s28 = scalar_lea.vmem (!%p2882_p5), [#allocation2], %s2868_s15 }
  0x53   : > { %2040 = dma.done.wait (%p2883_p0), %s382_s26, 256  }
  0x54   : > { %2042 = vsyncadd (%p2883_p0), %s382_s26, 4294967040  ;;  %p2884_p11 = scmp.eq.s32.totalorder %s2169_s21, 0 }
  0x56   : > { %2044 = dma.done.wait (%p2884_p11), [#allocation6], 2048   ;;  %p2885_p1 = pmov %p2884_p11 }
  0x57   : > { %v2071_v0 = vmov 0.0   ;;  %v441_v1 = vld [vmem:[#allocation5 + $0x8] sm:$0xff]  ;;  %v443_v2 = vld [vmem:[#allocation5 + $0x18] sm:$0xff]  ;;  %v440_v3 = vld [vmem:[#allocation5] sm:$0xff]  ;;  %p433_p4 = scmp.lt.s32.totalorder %s2169_s21, 1  ;;  %vm456_vm0 = vcmask 523264   ;;  %v542_v27 = vlaneseq }
  0x58   : > { %2046 = vsyncadd (%p2885_p1), [#allocation6], 4294965248  ;;  %527 = vmatprep.mubr.f32.mxu0 %v2071_v0  ;;  %v1555_v4 = vpack.c.bf16 %v443_v2, %v441_v1  ;;  %v442_v5 = vld [vmem:[#allocation5 + $0x10] sm:$0xff]  ;;  %v445_v6 = vld [vmem:[#allocation5 + $0x28] sm:$0xff]  ;;  %s2072_s13 = smov 17   ;;  %s2073_s22 = smov 2  }
  0x59   : > { %v447_v7 = vld [vmem:[#allocation5 + $0x38] sm:$0xff]  ;;  %v1557_v8 = vpack.c.bf16 %v442_v5, %v440_v3  ;;  %v444_v10 = vld [vmem:[#allocation5 + $0x20] sm:$0xff]  ;;  %v446_v11 = vld [vmem:[#allocation5 + $0x30] sm:$0xff]  ;;  %s434_s23 = scalar_select %p433_p4, %s2169_s21, 1  ;;  %v543_v28 = vand.u32 127, %v542_v27  ;;  %vm601_vm5 = vcmask 138240  }
  0x5a   : > { %v1559_v9 = vpack.c.bf16 %v447_v7, %v445_v6  ;;  %v449_v12 = vld [vmem:[#allocation5 + $0x48] sm:$0xff]  ;;  %1556 = vmatprep.subr.bf16.mxu0 %v1555_v4  ;;  %v451_v13 = vld [vmem:[#allocation5 + $0x58] sm:$0xff]  ;;  %v1561_v14 = vpack.c.bf16 %v446_v11, %v444_v10  ;;  %v448_v16 = vld [vmem:[#allocation5 + $0x40] sm:$0xff]  ;;  %s2074_s27 = smov 18   ;;  %s2075_s11 = smov 16   ;;  %vm632_vm6 = vcmask 15360  }
  0x5b   : > { %1558 = vmatpush1.bf16.msra.mxu0 %v1557_v8  ;;  %v1563_v15 = vpack.c.bf16 %v451_v13, %v449_v12  ;;  %v450_v17 = vld [vmem:[#allocation5 + $0x50] sm:$0xff]  ;;  %v453_v18 = vld [vmem:[#allocation5 + $0x68] sm:$0xff]  ;;  %v455_v19 = vld [vmem:[#allocation5 + $0x78] sm:$0xff]  ;;  %s1553_s25 = sshll.u32 %s434_s23, 4  ;;  %v544_v29 = vadd.s32 128, %v543_v28  ;;  %v549_v30 = vand.u32 15, %v543_v28 }
  0x5c   : > { %1560 = vmatprep.subr.bf16.mxu0 %v1559_v9  ;;  %v1565_v20 = vpack.c.bf16 %v450_v17, %v448_v16  ;;  %v1567_v21 = vpack.c.bf16 %v455_v19, %v453_v18  ;;  %v452_v22 = vld [vmem:[#allocation5 + $0x60] sm:$0xff]  ;;  %v454_v23 = vld [vmem:[#allocation5 + $0x70] sm:$0xff]  ;;  %s437_s12 = scalar_lea.vmem %s2848_s0, %s1553_s25  ;;  %v541_v44 = vld [vmem:[%s2290_s28 + $0x8] sm:$0xff]  ;;  %s2076_s17 = smov 34   ;;  %vm652_vm7 = vcmask 130048   ;;  %vm670_vm8 = vcmask 146432  }
  0x5d   : > { %v1569_v24 = vpack.c.bf16 %v454_v23, %v452_v22  ;;  %v438_v25 = vld [vmem:[%s437_s12] sm:$0xff]  ;;  %v439_v26 = vld [vmem:[%s437_s12 + $0x8] sm:$0xff]  ;;  %v556_v31 = vand.u32 15, %v544_v29  ;;  %vm575_vm1 = vcmp.ne.s32.totalorder %v549_v30, 15  ;;  %vm569_vm3 = vcmp.ne.s32.totalorder %v549_v30, 0  ;;  %s2077_s26 = smov 32  }
  0x5e   : > { %v540_v38 = vld [vmem:[%s2290_s28] sm:$0xff]  ;;  %v1542_v39 = vsel %vm575_vm1, 1.0, %v2071_v0  ;;  %v2333_v42 = vsel %vm569_vm3, 1.0, %v2071_v0  ;;  %s2078_s23 = smov 111   ;;  %s2079_s25 = smov 127   ;;  %vm706_vm9 = vcmask 277504  }
  0x5f   : > { %1562 = vmatpush1.bf16.msra.mxu0 %v1561_v14  ;;  %vm576_vm2 = vcmp.ne.s32.totalorder %v556_v31, 15  ;;  %vm570_vm4 = vcmp.ne.s32.totalorder %v556_v31, 0  ;;  %s2080_s14 = smov 126   ;;  %s2081_s30 = smov 112   ;;  %vm688_vm10 = vcmask 261120   ;;  %vm1019_vm11 = vcmask 719872  }
  0x60   : > { %1564 = vmatprep.subr.bf16.mxu0 %v1563_v15  ;;  %v1543_v40 = vsel %vm576_vm2, 1.0, %v2071_v0  ;;  %v2336_v43 = vsel %vm570_vm4, 1.0, %v2071_v0  ;;  %s2082_s12 = smov 110   ;;  %vm744_vm12 = vcmask 1039360   ;;  %vm784_vm13 = vcmask 1031168  }
  0x61   : > { %v1718_v41 = vpack.i.bf16 %v1543_v40, %v1542_v39  ;;  %v1723_v45 = vpack.i.bf16 %v2336_v43, %v2333_v42  ;;  %vm824_vm14 = vcmask 916480   ;;  %vm855_vm15 = vcmask 908288  }
  0x62   : > { %vm935_vm1 = vcmask 785408   ;;  %vm966_vm2 = vcmask 777216   ;;  %vm1006_vm3 = vcmask 769024   ;;  %vm1239_vm4 = vcmask 588800  }
  0x63   : > { %1566 = vmatpush1.bf16.msra.mxu0 %v1565_v20 }
  0x64   : > { %1568 = vmatprep.subr.bf16.mxu0 %v1567_v21 }
  0x67   : > { %1570 = vmatpush1.bf16.msra.mxu0 %v1569_v24 }
  0x6a   : > { %1538 = vmatmul.mubr.msk.f32.vlgmr.msra.gmra.mrb[0].mxu0 %vm456_vm0, %v438_v25 }
  0x6b   : > { %533 = vmatprep.mubr.f32.mxu0 %v2071_v0 }
  0x6e   : > { %1539 = vmatmul.mubr.msk.f32.gmra.mrb[2].mxu0 %vm456_vm0, %v439_v26  ;;  %vm895_vm0 = vcmask 900096  }
  0x6f   : > { %1307 = vmatprep.mubr.f32.mxu0 %v2071_v0 }
 0x13d   : > { %v2308_v32 = vpop.f32.mrb[0].mxu0 }
 0x13e   : > { %589 = vrot.lane.b32.xlu0 %v2308_v32, %s2072_s13  ;;  %v2312_v33 = vpop.f32.mrb[1].mxu0 }
 0x141   : > { %v2314_v34 = vpop.f32.mrb[2].mxu0 }
 0x142   : > { %v1641_v35 = vpack.c.bf16 %v2314_v34, %v2308_v32  ;;  %591 = vrot.lane.b32.xlu0 %v2312_v33, %s2072_s13  ;;  %593 = vrot.lane.b32.xlu1 %v2314_v34, %s2072_s13  ;;  %v2322_v36 = vpop.f32.mrb[3].mxu0 }
 0x143   : > { %v1639_v37 = vpack.c.bf16 %v2322_v36, %v2312_v33 }
 0x146   : > { %597 = vrot.lane.b32.xlu0 %v540_v38, %s2072_s13  ;;  %595 = vrot.lane.b32.xlu1 %v2322_v36, %s2072_s13 }
 0x14a   : > { %1719 = vrot.lane.b32.xlu0 %v1718_v41, %s2073_s22  ;;  %599 = vrot.lane.b32.xlu1 %v541_v44, %s2072_s13  ;;  %s2869_s22 = smov 96  }
 0x14e   : > { %1729 = vrot.lane.b32.xlu0 %v1718_v41, %s2074_s27  ;;  %1724 = vrot.lane.b32.xlu1 %v1723_v45, %s2075_s11  ;;  %s2084_s27 = smov 95   ;;  %s2085_s11 = smov 94  }
 0x152   : > { %1739 = vrot.lane.b32.xlu0 %v1718_v41, %s2076_s17  ;;  %1734 = vrot.lane.b32.xlu1 %v1723_v45, %s2077_s26 }
 0x1b0   : > { %v590_v46 = vpop.permute.xlu0 %589 }
 0x1b1   : > { %v2356_v53 = vsel %vm601_vm5, 0.0, %v590_v46 }
 0x1b2   : > { %v620_v61 = vmul.f32 %v2333_v42, %v2356_v53 }
 0x1b4   : > { %v592_v47 = vpop.permute.xlu0 %591  ;;  %v594_v48 = vpop.permute.xlu1 %593 }
 0x1b5   : > { %v2343_v49 = vsel %vm601_vm5, %v590_v46, %v592_v47  ;;  %v2346_v50 = vsel %vm601_vm5, %v592_v47, 0.0  ;;  %v2349_v51 = vsel %vm601_vm5, 0.0, %v594_v48 }
 0x1b6   : > { %v2353_v52 = vpack.i.bf16 %v2346_v50, %v2343_v49  ;;  %v622_v58 = vmul.f32 %v2333_v42, %v2349_v51  ;;  %v621_v59 = vmul.f32 %v2336_v43, %v2343_v49 }
 0x1b8   : > { %1759 = vrot.lane.b32.xlu0 %v2353_v52, %s2078_s23  ;;  %v598_v54 = vpop.permute.xlu0 %597  ;;  %v2360_v55 = vpop.permute.xlu1 %595  ;;  %v1573_v5 = vpack.c.bf16 %v622_v58, %v620_v61 }
 0x1b9   : > { %v2363_v56 = vsel %vm601_vm5, 0.0, %v598_v54  ;;  %v2367_v57 = vsel %vm601_vm5, %v594_v48, %v2360_v55  ;;  %v1783_v48 = vpack.i.bf16 %v2349_v51, %v2356_v53 }
 0x1ba   : > { %738 = vrot.lane.b32.xlu1 %v2363_v56, %s2079_s25  ;;  %v623_v60 = vmul.f32 %v2336_v43, %v2367_v57 }
 0x1bc   : > { %v1720_v62 = vpop.permute.xlu0 %1719  ;;  %v600_v63 = vpop.permute.xlu1 %599  ;;  %v1571_v1 = vpack.c.bf16 %v623_v60, %v621_v59  ;;  %v2479_v59 = vpack.i.bf16 %v2367_v57, %v2356_v53 }
 0x1bd   : > { %v2379_v2 = vunpack.i.h.bf16 %v1720_v62  ;;  %v2381_v3 = vunpack.i.l.bf16 %v1720_v62  ;;  %v2384_v4 = vsel %vm601_vm5, %v600_v63, 0.0  ;;  %v2387_v6 = vsel %vm601_vm5, %v598_v54, %v600_v63 }
 0x1be   : > { %1572 = vmatprep.subr.bf16.mxu1 %v1571_v1  ;;  %v1748_v39 = vpack.i.bf16 %v2384_v4, %v2387_v6  ;;  %v2443_v40 = vpack.i.bf16 %v2349_v51, %v2384_v4  ;;  %v2491_v62 = vsel %vm601_vm5, %v2360_v55, 0.0 }
 0x1bf   : > { %1574 = vmatpush1.bf16.msra.mxu1 %v1573_v5  ;;  %v2391_v7 = vsel %vm632_vm6, %v2381_v3, %v2379_v2  ;;  %v639_v8 = vmul.f32 %v2379_v2, %v2346_v50  ;;  %v645_v9 = vmul.f32 %v2379_v2, %v2384_v4  ;;  %v643_v24 = vmul.f32 %v2381_v3, %v2363_v56 }
 0x1c0   : > { %v1730_v10 = vpop.permute.xlu0 %1729  ;;  %v1725_v11 = vpop.permute.xlu1 %1724  ;;  %v638_v12 = vmul.f32 %v2391_v7, %v2343_v49  ;;  %v644_v13 = vmul.f32 %v2391_v7, %v2387_v6  ;;  %v637_v60 = vmul.f32 %v2381_v3, %v2356_v53  ;;  %v640_v61 = vmul.f32 %v2381_v3, %v2349_v51 }
 0x1c1   : > { %v2401_v14 = vunpack.i.h.bf16 %v1730_v10  ;;  %v2403_v15 = vunpack.i.l.bf16 %v1730_v10  ;;  %v2405_v16 = vunpack.i.h.bf16 %v1725_v11  ;;  %v2407_v17 = vunpack.i.l.bf16 %v1725_v11 }
 0x1c2   : > { %v1763_v18 = vpack.i.bf16 %v639_v8, %v638_v12  ;;  %v1743_v19 = vpack.i.bf16 %v645_v9, %v644_v13  ;;  %v1793_v63 = vpack.i.bf16 %v2387_v6, %v2491_v62  ;;  %v1803_v1 = vpack.i.bf16 %v640_v61, %v637_v60 }
 0x1c3   : > { %v2411_v20 = vsel %vm652_vm7, %v2407_v17, %v2405_v16  ;;  %v659_v21 = vmul.f32 %v2405_v16, %v2346_v50  ;;  %v2417_v22 = vsel %vm670_vm8, %v2403_v15, %v2401_v14  ;;  %v677_v27 = vmul.f32 %v2401_v14, %v2346_v50 }
 0x1c4   : > { %1764 = vrot.lane.b32.xlu0 %v1763_v18, %s2080_s14  ;;  %1744 = vrot.lane.b32.xlu1 %v1743_v19, %s2080_s14  ;;  %v658_v23 = vmul.f32 %v2411_v20, %v2343_v49  ;;  %v676_v26 = vmul.f32 %v2417_v22, %v2343_v49  ;;  %v1740_v28 = vpop.permute.xlu0 %1739  ;;  %v663_v29 = vmul.f32 %v2407_v17, %v2363_v56  ;;  %v1735_v9 = vpop.permute.xlu1 %1734 }
 0x1c5   : > { %v2433_v31 = vunpack.i.h.bf16 %v1740_v28  ;;  %v2435_v38 = vunpack.i.l.bf16 %v1740_v28  ;;  %v660_v5 = vmul.f32 %v2407_v17, %v2349_v51  ;;  %v665_v8 = vmul.f32 %v2405_v16, %v2384_v4 }
 0x1c6   : > { %v1768_v25 = vpack.i.bf16 %v659_v21, %v658_v23  ;;  %v1773_v30 = vpack.i.bf16 %v677_v27, %v676_v26  ;;  %v1798_v10 = vpack.i.bf16 %v2491_v62, %v2367_v57  ;;  %v641_v55 = vmul.f32 %v2391_v7, %v2367_v57 }
 0x1c7   : > { %v2447_v41 = vsel %vm706_vm9, %v2435_v38, %v2433_v31  ;;  %v2451_v44 = vmul.f32 %v2433_v31, %v2346_v50  ;;  %v2462_v46 = vmul.f32 %v2435_v38, %v2356_v53  ;;  %v2466_v47 = vmul.f32 %v2435_v38, %v2349_v51 }
 0x1c8   : > { %778 = vrot.lane.b32.xlu1 %v643_v24, %s2080_s14  ;;  %1769 = vrot.lane.b32.xlu0 %v1768_v25, %s2081_s30  ;;  %v2458_v45 = vmul.f32 %v2447_v41, %v2343_v49  ;;  %v1808_v11 = vpack.i.bf16 %v660_v5, %v665_v8  ;;  %v642_v12 = vmul.f32 %v2379_v2, %v2491_v62  ;;  %v2511_v19 = vunpack.i.h.bf16 %v1735_v9 }
 0x1c9   : > { %v1888_v58 = vpack.i.bf16 %v2466_v47, %v2462_v46  ;;  %v678_v13 = vmul.f32 %v2403_v15, %v2349_v51  ;;  %v683_v18 = vmul.f32 %v2401_v14, %v2384_v4  ;;  %v2513_v21 = vunpack.i.l.bf16 %v1735_v9  ;;  %v1102_v46 = vld [vmem:[%s2853_s5] sm:$0xff] }
 0x1ca   : > { %v1883_v54 = vpack.i.bf16 %v2451_v44, %v2458_v45  ;;  %v1818_v23 = vpack.i.bf16 %v642_v12, %v641_v55  ;;  %v657_v25 = vmul.f32 %v2407_v17, %v2356_v53  ;;  %v661_v26 = vmul.f32 %v2411_v20, %v2367_v57 }
 0x1cb   : > { %v1813_v24 = vpack.i.bf16 %v678_v13, %v683_v18  ;;  %v2523_v27 = vsel %vm688_vm10, %v2513_v21, %v2511_v19  ;;  %v662_v28 = vmul.f32 %v2405_v16, %v2491_v62  ;;  %v695_v60 = vmul.f32 %v2511_v19, %v2346_v50 }
 0x1cc   : > { %818 = vrot.lane.b32.xlu1 %v663_v29, %s2081_s30  ;;  %1774 = vrot.lane.b32.xlu0 %v1773_v30, %s2082_s12  ;;  %v664_v29 = vmul.f32 %v2411_v20, %v2387_v6  ;;  %v681_v30 = vmul.f32 %v2403_v15, %v2363_v56  ;;  %v700_v8 = vmul.f32 %v2523_v27, %v2387_v6 }
 0x1cd   : > { %v693_v9 = vmul.f32 %v2513_v21, %v2356_v53  ;;  %v675_v55 = vmul.f32 %v2403_v15, %v2356_v53  ;;  %v680_v13 = vmul.f32 %v2401_v14, %v2491_v62  ;;  %v682_v18 = vmul.f32 %v2417_v22, %v2387_v6 }
 0x1ce   : > { %v1838_v61 = vpack.i.bf16 %v664_v29, %v662_v28  ;;  %v716_v28 = vmul.f32 %v2433_v31, %v2491_v62  ;;  %v718_v44 = vmul.f32 %v2447_v41, %v2387_v6  ;;  %v719_v45 = vmul.f32 %v2433_v31, %v2384_v4 }
 0x1cf   : > { %v1863_v53 = vpack.i.bf16 %v682_v18, %v680_v13 }
 0x1d0   : > { %1749 = vrot.lane.b32.xlu1 %v1748_v39, %s2078_s23  ;;  %1779 = vrot.lane.b32.xlu0 %v2443_v40, %s2079_s25  ;;  %v1823_v39 = vpack.i.bf16 %v661_v26, %v657_v25  ;;  %v715_v26 = vmul.f32 %v2447_v41, %v2367_v57 }
 0x1d4   : > { %849 = vrot.lane.b32.xlu1 %v2363_v56, %s2078_s23  ;;  %1784 = vrot.lane.b32.xlu0 %v1783_v48, %s2078_s23  ;;  %v694_v48 = vmul.f32 %v2523_v27, %v2343_v49  ;;  %v696_v49 = vmul.f32 %v2513_v21, %v2349_v51  ;;  %v699_v51 = vmul.f32 %v2513_v21, %v2363_v56 }
 0x1d6   : > { %v1828_v5 = vpack.i.bf16 %v695_v60, %v694_v48 }
 0x1d8   : > { %1754 = vrot.lane.b32.xlu1 %v2353_v52, %s2079_s25  ;;  %1789 = vrot.lane.b32.xlu0 %v2479_v59, %s2079_s25 }
 0x1dc   : > { %1794 = vrot.lane.b32.xlu1 %v1793_v63, %s2079_s25  ;;  %1804 = vrot.lane.b32.xlu0 %v1803_v1, %s2080_s14  ;;  %v701_v1 = vmul.f32 %v2511_v19, %v2384_v4 }
 0x1de   : > { %v1843_v50 = vpack.i.bf16 %v701_v1, %v700_v8 }
 0x1e0   : > { %1799 = vrot.lane.b32.xlu1 %v1798_v10, %s2078_s23  ;;  %1809 = vrot.lane.b32.xlu0 %v1808_v11, %s2081_s30  ;;  %v1833_v10 = vpack.i.bf16 %v696_v49, %v693_v9  ;;  %v679_v11 = vmul.f32 %v2417_v22, %v2367_v57 }
 0x1e2   : > { %v1848_v12 = vpack.i.bf16 %v679_v11, %v675_v55  ;;  %v624_v55 = vmul.f32 %v2333_v42, %v2363_v56 }
 0x1e4   : > { %1819 = vrot.lane.b32.xlu1 %v1818_v23, %s2080_s14  ;;  %1814 = vrot.lane.b32.xlu0 %v1813_v24, %s2082_s12  ;;  %v697_v23 = vmul.f32 %v2523_v27, %v2367_v57  ;;  %v698_v24 = vmul.f32 %v2511_v19, %v2491_v62  ;;  %v2086_v57 = vmov 0  }
 0x1e5   : > { %1898 = vset.pattern.permute.xlu0 %v2086_v57  ;;  %1899 = vset.pattern.permute.xlu1 %v2086_v57 }
 0x1e6   : > { %v1868_v25 = vpack.i.bf16 %v698_v24, %v697_v23 }
 0x1e8   : > { %889 = vrot.lane.b32.xlu1 %v681_v30, %s2082_s12  ;;  %1824 = vrot.lane.b32.xlu0 %v1823_v39, %s2081_s30 }
 0x1ec   : > { %1839 = vrot.lane.b32.xlu1 %v1838_v61, %s2081_s30  ;;  %1829 = vrot.lane.b32.xlu0 %v1828_v5, %s2869_s22 }
 0x1f0   : > { %1844 = vrot.lane.b32.xlu1 %v1843_v50, %s2869_s22  ;;  %1834 = vrot.lane.b32.xlu0 %v1833_v10, %s2869_s22  ;;  %v625_v10 = vmul.f32 %v2336_v43, %v2387_v6 }
 0x1f4   : > { %929 = vrot.lane.b32.xlu1 %v699_v51, %s2869_s22  ;;  %1849 = vrot.lane.b32.xlu0 %v1848_v12, %s2082_s12 }
 0x1f8   : > { %1864 = vrot.lane.b32.xlu1 %v1863_v53, %s2082_s12  ;;  %1854 = vrot.lane.b32.xlu0 %v2353_v52, %s2084_s27  ;;  %v582_v52 = vld [vmem:[%s2851_s3 + $0x8] sm:$0xff] }
 0x1f9   : > { %1544 = vmatprep.mubr.msk.f32.mxu1 %vm1019_vm11, %v582_v52 }
 0x1fc   : > { %1869 = vrot.lane.b32.xlu1 %v1868_v25, %s2869_s22  ;;  %1859 = vrot.lane.b32.xlu0 %v2479_v59, %s2084_s27  ;;  %v717_v59 = vmul.f32 %v2435_v38, %v2363_v56  ;;  %s2887_s22 = sshll.u32 %s2284_s24, 4 }
 0x200   : > { %1874 = vrot.lane.b32.xlu1 %v1793_v63, %s2084_s27  ;;  %1879 = vrot.lane.b32.xlu0 %v2443_v40, %s2084_s27  ;;  %v1893_v40 = vpack.i.bf16 %v716_v28, %v715_v26 }
 0x204   : > { %960 = vrot.lane.b32.xlu1 %v2363_v56, %s2084_s27  ;;  %1884 = vrot.lane.b32.xlu0 %v1883_v54, %s2085_s11  ;;  %v1094_v54 = vld [vmem:[%s2852_s4] sm:$0xff] }
 0x208   : > { %1894 = vrot.lane.b32.xlu1 %v1893_v40, %s2085_s11  ;;  %1889 = vrot.lane.b32.xlu0 %v1888_v58, %s2085_s11 }
 0x20c   : > { %1002 = vrot.lane.b32.xlu1 %v718_v44, %s2085_s11  ;;  %1004 = vrot.lane.b32.xlu0 %v719_v45, %s2085_s11 }
 0x210   : > { %1000 = vrot.lane.b32.xlu1 %v717_v59, %s2085_s11  ;;  %1097 = vperm.xlu0 %1898, %v1094_v54  }
 0x214   : > { %1105 = vperm.xlu1 %1899, %v1102_v46  }
 0x22a   : > { %v2609_v4 = vpop.permute.xlu0 %1759 }
 0x22c   : > { %v739_v47 = vpop.permute.xlu1 %738 }
 0x236   : > { %v1765_v58 = vpop.permute.xlu0 %1764  ;;  %v2611_v62 = vpop.permute.xlu1 %1744 }
 0x237   : > { %v1767_v59 = vunpack.i.h.bf16 %v1765_v58  ;;  %v1766_v46 = vunpack.i.l.bf16 %v1765_v58 }
 0x239   : > { %v786_v58 = vsel %vm784_vm13, %v1766_v46, %v1767_v59 }
 0x23a   : > { %v2613_v63 = vpop.permute.xlu1 %778  ;;  %v2615_v29 = vpop.permute.xlu0 %1769 }
 0x23e   : > { %v2617_v30 = vpop.permute.xlu1 %818  ;;  %v2619_v39 = vpop.permute.xlu0 %1774 }
 0x242   : > { %v2621_v48 = vpop.permute.xlu1 %1749  ;;  %v1780_v60 = vpop.permute.xlu0 %1779 }
 0x243   : > { %v1782_v24 = vunpack.i.h.bf16 %v1780_v60  ;;  %v1781_v25 = vunpack.i.l.bf16 %v1780_v60  ;;  %v1772_v60 = vunpack.i.h.bf16 %v2615_v29 }
 0x246   : > { %v2623_v61 = vpop.permute.xlu1 %849  ;;  %v2625_v1 = vpop.permute.xlu0 %1784 }
 0x24a   : > { %v1755_v5 = vpop.permute.xlu1 %1754  ;;  %v1790_v8 = vpop.permute.xlu0 %1789 }
 0x24b   : > { %v1757_v9 = vunpack.i.h.bf16 %v1755_v5  ;;  %v1756_v49 = vunpack.i.l.bf16 %v1755_v5  ;;  %v1791_v50 = vunpack.i.l.bf16 %v1790_v8  ;;  %v1792_v11 = vunpack.i.h.bf16 %v1790_v8 }
 0x24c   : > { %v1771_v5 = vunpack.i.l.bf16 %v2615_v29 }
 0x24d   : > { %v746_v51 = vsel %vm744_vm12, %v1756_v49, %v1757_v9  ;;  %v745_v12 = vsel %vm744_vm12, %v1791_v50, %v1756_v49  ;;  %v747_v56 = vsel %vm744_vm12, %v1782_v24, %v1792_v11  ;;  %v1747_v9 = vunpack.i.h.bf16 %v2611_v62 }
 0x24e   : > { %v1795_v13 = vpop.permute.xlu1 %1794  ;;  %v1805_v18 = vpop.permute.xlu0 %1804  ;;  %v1575_v53 = vpack.c.bf16 %v746_v51, %v625_v10  ;;  %v1577_v23 = vpack.c.bf16 %v745_v12, %v624_v55 }
 0x24f   : > { %v1797_v26 = vunpack.i.h.bf16 %v1795_v13  ;;  %v1796_v28 = vunpack.i.l.bf16 %v1795_v13  ;;  %v1806_v8 = vunpack.i.l.bf16 %v1805_v18  ;;  %v1807_v10 = vunpack.i.h.bf16 %v1805_v18 }
 0x250   : > { %1576 = vmatprep.subr.bf16.mxu1 %v1575_v53  ;;  %v826_v13 = vsel %vm824_vm14, %v1771_v5, %v1772_v60 }
 0x251   : > { %1578 = vmatpush1.bf16.msra.mxu1 %v1577_v23  ;;  %v748_v6 = vsel %vm744_vm12, %v1792_v11, %v1796_v28  ;;  %v750_v52 = vsel %vm744_vm12, %v1797_v26, %v1781_v25  ;;  %v749_v40 = vsel %vm744_vm12, %v739_v47, %v1797_v26  ;;  %v1746_v47 = vunpack.i.l.bf16 %v2611_v62 }
 0x252   : > { %v2637_v57 = vpop.permute.xlu1 %1799  ;;  %v1810_v44 = vpop.permute.xlu0 %1809  ;;  %v1579_v45 = vpack.c.bf16 %v750_v52, %v748_v6  ;;  %v1581_v54 = vpack.c.bf16 %v749_v40, %v747_v56  ;;  %v785_v12 = vsel %vm784_vm13, %v1806_v8, %v1766_v46 }
 0x253   : > { %v790_v62 = vsel %vm784_vm13, %v1746_v47, %v1747_v9  ;;  %v1802_v18 = vunpack.i.h.bf16 %v2637_v57  ;;  %v1801_v28 = vunpack.i.l.bf16 %v2637_v57  ;;  %v789_v52 = vsel %vm784_vm13, %v2613_v63, %v1746_v47 }
 0x254   : > { %1580 = vmatprep.subr.bf16.mxu1 %v1579_v45  ;;  %v1587_v6 = vpack.c.bf16 %v826_v13, %v790_v62  ;;  %v1762_v45 = vunpack.i.h.bf16 %v2609_v4  ;;  %v1812_v57 = vunpack.i.h.bf16 %v1810_v44  ;;  %v1811_v8 = vunpack.i.l.bf16 %v1810_v44 }
 0x255   : > { %1582 = vmatpush1.bf16.msra.mxu1 %v1581_v54  ;;  %v1761_v54 = vunpack.i.l.bf16 %v2609_v4  ;;  %v1752_v63 = vunpack.i.h.bf16 %v2621_v48  ;;  %v1751_v47 = vunpack.i.l.bf16 %v2621_v48  ;;  %v1787_v44 = vunpack.i.h.bf16 %v2625_v1 }
 0x256   : > { %v1820_v49 = vpop.permute.xlu1 %1819  ;;  %v2642_v50 = vpop.permute.xlu0 %1814  ;;  %v1777_v13 = vunpack.i.h.bf16 %v2619_v39 }
 0x257   : > { %v1822_v55 = vunpack.i.h.bf16 %v1820_v49  ;;  %v1821_v11 = vunpack.i.l.bf16 %v1820_v49 }
 0x259   : > { %v788_v51 = vsel %vm784_vm13, %v1821_v11, %v1822_v55  ;;  %v787_v29 = vsel %vm784_vm13, %v1807_v10, %v1821_v11 }
 0x25a   : > { %v2650_v53 = vpop.permute.xlu1 %889  ;;  %v1825_v23 = vpop.permute.xlu0 %1824  ;;  %v1583_v24 = vpack.c.bf16 %v788_v51, %v786_v58  ;;  %v1585_v25 = vpack.c.bf16 %v787_v29, %v785_v12  ;;  %v1786_v58 = vunpack.i.l.bf16 %v2625_v1 }
 0x25b   : > { %v1826_v26 = vunpack.i.l.bf16 %v1825_v23  ;;  %v1827_v56 = vunpack.i.h.bf16 %v1825_v23  ;;  %v1776_v23 = vunpack.i.l.bf16 %v2619_v39 }
 0x25c   : > { %1584 = vmatprep.subr.bf16.mxu1 %v1583_v24  ;;  %v857_v24 = vsel %vm855_vm15, %v1761_v54, %v1762_v45  ;;  %v860_v45 = vsel %vm855_vm15, %v2623_v61, %v1751_v47 }
 0x25d   : > { %1586 = vmatpush1.bf16.msra.mxu1 %v1585_v25  ;;  %v825_v40 = vsel %vm824_vm14, %v1826_v26, %v1771_v5  ;;  %v859_v5 = vsel %vm855_vm15, %v1801_v28, %v1802_v18  ;;  %v827_v55 = vsel %vm824_vm14, %v1812_v57, %v1827_v56  ;;  %v858_v26 = vsel %vm855_vm15, %v1787_v44, %v1801_v28 }
 0x25e   : > { %v1840_v59 = vpop.permute.xlu1 %1839  ;;  %v2660_v46 = vpop.permute.xlu0 %1829  ;;  %1588 = vmatprep.subr.bf16.mxu1 %v1587_v6  ;;  %v1589_v60 = vpack.c.bf16 %v825_v40, %v789_v52  ;;  %v1595_v25 = vpack.c.bf16 %v859_v5, %v857_v24  ;;  %v856_v18 = vsel %vm855_vm15, %v1786_v58, %v1761_v54  ;;  %v897_v39 = vsel %vm895_vm0, %v1776_v23, %v1777_v13 }
 0x25f   : > { %v1842_v9 = vunpack.i.h.bf16 %v1840_v59  ;;  %v1841_v49 = vunpack.i.l.bf16 %v1840_v59  ;;  %v1597_v52 = vpack.c.bf16 %v858_v26, %v856_v18  ;;  %v1817_v59 = vunpack.i.h.bf16 %v2642_v50 }
 0x260   : > { %v1816_v54 = vunpack.i.l.bf16 %v2642_v50  ;;  %v1831_v5 = vunpack.i.l.bf16 %v2660_v46 }
 0x261   : > { %1590 = vmatpush1.bf16.msra.mxu1 %v1589_v60  ;;  %v828_v10 = vsel %vm824_vm14, %v1827_v56, %v1841_v49  ;;  %v830_v4 = vsel %vm824_vm14, %v1842_v9, %v1811_v8  ;;  %v829_v11 = vsel %vm824_vm14, %v2617_v30, %v1842_v9  ;;  %v861_v30 = vsel %vm855_vm15, %v1751_v47, %v1752_v63 }
 0x262   : > { %v2672_v51 = vpop.permute.xlu1 %1844  ;;  %v1835_v12 = vpop.permute.xlu0 %1834  ;;  %v1591_v48 = vpack.c.bf16 %v830_v4, %v828_v10  ;;  %v1593_v29 = vpack.c.bf16 %v829_v11, %v827_v55  ;;  %v1599_v40 = vpack.c.bf16 %v897_v39, %v861_v30  ;;  %v1832_v9 = vunpack.i.h.bf16 %v2660_v46 }
 0x263   : > { %v1836_v61 = vunpack.i.l.bf16 %v1835_v12  ;;  %v1847_v50 = vunpack.i.h.bf16 %v2672_v51  ;;  %v1846_v58 = vunpack.i.l.bf16 %v2672_v51 }
 0x264   : > { %1592 = vmatprep.subr.bf16.mxu1 %v1591_v48  ;;  %v937_v30 = vsel %vm935_vm1, %v1831_v5, %v1832_v9 }
 0x265   : > { %1594 = vmatpush1.bf16.msra.mxu1 %v1593_v29 }
 0x266   : > { %v2679_v1 = vpop.permute.xlu1 %929  ;;  %v1850_v62 = vpop.permute.xlu0 %1849  ;;  %1596 = vmatprep.subr.bf16.mxu1 %v1595_v25 }
 0x267   : > { %v1851_v6 = vunpack.i.l.bf16 %v1850_v62  ;;  %v1852_v56 = vunpack.i.h.bf16 %v1850_v62 }
 0x269   : > { %1598 = vmatpush1.bf16.msra.mxu1 %v1597_v52  ;;  %v896_v28 = vsel %vm895_vm0, %v1851_v6, %v1776_v23  ;;  %v898_v10 = vsel %vm895_vm0, %v1817_v59, %v1852_v56  ;;  %v1837_v23 = vunpack.i.h.bf16 %v1835_v12  ;;  %v941_v12 = vsel %vm935_vm1, %v1846_v58, %v1847_v50 }
 0x26a   : > { %v1865_v60 = vpop.permute.xlu1 %1864  ;;  %v1855_v57 = vpop.permute.xlu0 %1854  ;;  %1600 = vmatprep.subr.bf16.mxu1 %v1599_v40  ;;  %v1601_v8 = vpack.c.bf16 %v896_v28, %v860_v45 }
 0x26b   : > { %v1867_v49 = vunpack.i.h.bf16 %v1865_v60  ;;  %v1866_v63 = vunpack.i.l.bf16 %v1865_v60  ;;  %v1857_v47 = vunpack.i.h.bf16 %v1855_v57  ;;  %v1856_v4 = vunpack.i.l.bf16 %v1855_v57 }
 0x26d   : > { %1602 = vmatpush1.bf16.msra.mxu1 %v1601_v8  ;;  %v899_v55 = vsel %vm895_vm0, %v1852_v56, %v1866_v63  ;;  %v901_v11 = vsel %vm895_vm0, %v1867_v49, %v1816_v54  ;;  %v900_v44 = vsel %vm895_vm0, %v2650_v53, %v1867_v49  ;;  %v936_v53 = vsel %vm935_vm1, %v1836_v61, %v1831_v5 }
 0x26e   : > { %v1870_v48 = vpop.permute.xlu1 %1869  ;;  %v1860_v29 = vpop.permute.xlu0 %1859  ;;  %v1603_v46 = vpack.c.bf16 %v901_v11, %v899_v55  ;;  %v1605_v13 = vpack.c.bf16 %v900_v44, %v898_v10  ;;  %v968_v51 = vsel %vm966_vm2, %v1856_v4, %v1857_v47  ;;  %v940_v49 = vsel %vm935_vm1, %v2679_v1, %v1846_v58 }
 0x26f   : > { %v1872_v24 = vunpack.i.h.bf16 %v1870_v48  ;;  %v1871_v25 = vunpack.i.l.bf16 %v1870_v48  ;;  %v1861_v26 = vunpack.i.l.bf16 %v1860_v29  ;;  %v1862_v40 = vunpack.i.h.bf16 %v1860_v29 }
 0x270   : > { %1604 = vmatprep.subr.bf16.mxu1 %v1603_v46  ;;  %v1611_v60 = vpack.c.bf16 %v968_v51, %v941_v12 }
 0x271   : > { %1606 = vmatpush1.bf16.msra.mxu1 %v1605_v13  ;;  %v939_v62 = vsel %vm935_vm1, %v1871_v25, %v1872_v24  ;;  %v938_v18 = vsel %vm935_vm1, %v1837_v23, %v1871_v25  ;;  %v967_v57 = vsel %vm966_vm2, %v1861_v26, %v1856_v4 }
 0x272   : > { %v1875_v6 = vpop.permute.xlu1 %1874  ;;  %v1880_v52 = vpop.permute.xlu0 %1879  ;;  %v1607_v39 = vpack.c.bf16 %v939_v62, %v937_v30  ;;  %v1609_v56 = vpack.c.bf16 %v938_v18, %v936_v53  ;;  %v1613_v47 = vpack.c.bf16 %v967_v57, %v940_v49 }
 0x273   : > { %v1877_v45 = vunpack.i.h.bf16 %v1875_v6  ;;  %v1876_v28 = vunpack.i.l.bf16 %v1875_v6  ;;  %v1881_v59 = vunpack.i.l.bf16 %v1880_v52  ;;  %v1882_v8 = vunpack.i.h.bf16 %v1880_v52  ;;  %v581_v52 = vld [vmem:[%s2851_s3] sm:$0xff] }
 0x274   : > { %1608 = vmatprep.subr.bf16.mxu1 %v1607_v39 }
 0x275   : > { %1610 = vmatpush1.bf16.msra.mxu1 %v1609_v56  ;;  %v970_v54 = vsel %vm966_vm2, %v1862_v40, %v1876_v28  ;;  %v972_v9 = vsel %vm966_vm2, %v1877_v45, %v1881_v59  ;;  %v969_v55 = vsel %vm966_vm2, %v1882_v8, %v1862_v40 }
 0x276   : > { %v961_v63 = vpop.permute.xlu1 %960  ;;  %v1885_v5 = vpop.permute.xlu0 %1884  ;;  %1612 = vmatprep.subr.bf16.mxu1 %v1611_v60  ;;  %v1615_v10 = vpack.c.bf16 %v972_v9, %v970_v54 }
 0x277   : > { %v971_v61 = vsel %vm966_vm2, %v961_v63, %v1877_v45  ;;  %v1887_v11 = vunpack.i.h.bf16 %v1885_v5  ;;  %v1886_v4 = vunpack.i.l.bf16 %v1885_v5 }
 0x278   : > { %v1617_v44 = vpack.c.bf16 %v971_v61, %v969_v55 }
 0x279   : > { %1614 = vmatpush1.bf16.msra.mxu1 %v1613_v47  ;;  %v1008_v13 = vsel %vm1006_vm3, %v1886_v4, %v1887_v11 }
 0x27a   : > { %v1895_v50 = vpop.permute.xlu1 %1894  ;;  %v1890_v48 = vpop.permute.xlu0 %1889  ;;  %1616 = vmatprep.subr.bf16.mxu1 %v1615_v10 }
 0x27b   : > { %v1897_v29 = vunpack.i.h.bf16 %v1895_v50  ;;  %v1896_v46 = vunpack.i.l.bf16 %v1895_v50  ;;  %v1892_v1 = vunpack.i.h.bf16 %v1890_v48  ;;  %v1891_v58 = vunpack.i.l.bf16 %v1890_v48 }
 0x27d   : > { %1618 = vmatpush1.bf16.msra.mxu1 %v1617_v44  ;;  %v1010_v23 = vsel %vm1006_vm3, %v1896_v46, %v1897_v29  ;;  %v1007_v24 = vsel %vm1006_vm3, %v1891_v58, %v1886_v4  ;;  %v1009_v25 = vsel %vm1006_vm3, %v1892_v1, %v1896_v46 }
 0x27e   : > { %v1003_v26 = vpop.permute.xlu1 %1002  ;;  %v1005_v30 = vpop.permute.xlu0 %1004  ;;  %v1619_v62 = vpack.c.bf16 %v1010_v23, %v1008_v13  ;;  %v1621_v53 = vpack.c.bf16 %v1009_v25, %v1007_v24 }
 0x27f   : > { %v1012_v18 = vsel %vm1006_vm3, %v1003_v26, %v1005_v30 }
 0x280   : > { %1620 = vmatprep.subr.bf16.mxu1 %v1619_v62 }
 0x281   : > { %1622 = vmatpush1.bf16.msra.mxu1 %v1621_v53 }
 0x282   : > { %v1001_v51 = vpop.permute.xlu1 %1000  ;;  %1075 = vmatprep.subr.mxu1 %v1012_v18 }
 0x283   : > { %v1011_v6 = vsel %vm1006_vm3, %v1001_v51, %v1003_v26 }
 0x285   : > { %1076 = vmatpush1.msra.mxu1 %v1011_v6 }
 0x286   : > { %1088 = vmatmul.mubr.f32.vlgmr.msra.gmra.mrb[0].mxu1 %v581_v52 }
 0x28f   : > { %v1098_v39 = vpop.permute.xlu0 %1097 }
 0x293   : > { %v1106_v12 = vpop.permute.xlu1 %1105 }
 0x359   : > { %v1089_v56 = vpop.f32.mrb[0].mxu1 }
 0x35a   : > { %v1100_v40 = vmul.f32 %v1098_v39, %v1089_v56  ;;  %v1091_v45 = vpop.f32.mrb[1].mxu1 }
 0x35b   : > { %v1101_v28 = vmul.f32 %v1098_v39, %v1091_v45 }
 0x35c   : > { %v1108_v59 = vadd.f32 %v1106_v12, %v1100_v40 }
 0x35d   : > { %v1109_v60 = vadd.f32 %v1106_v12, %v1101_v28 }
 0x35e   : > { %v1110_v57 = vmax.f32 %v1108_v59, 0.0 }
 0x35f   : > { %v1111_v8 = vmax.f32 %v1109_v60, 0.0 }
 0x360   : > { %1115 = vrot.lane.b32.xlu1 %v1110_v57, %s2072_s13 }
 0x361   : > { %1117 = vrot.lane.b32.xlu0 %v1111_v8, %s2072_s13  ;;  %s2886_s13 = smov 96  }
 0x3d2   : > { %v1116_v54 = vpop.permute.xlu1 %1115 }
 0x3d3   : > { %v1123_v9 = vsel %vm601_vm5, 0.0, %v1116_v54  ;;  %v1118_v49 = vpop.permute.xlu0 %1117 }
 0x3d4   : > { %v1119_v63 = vsel %vm601_vm5, %v1116_v54, %v1118_v49  ;;  %v1124_v5 = vsel %vm601_vm5, %v1118_v49, 0.0  ;;  %1180 = vrot.lane.b32.xlu1 %v1123_v9, %s2078_s23  ;;  %1144 = vrot.lane.b32.xlu0 %v1123_v9, %s2079_s25  ;;  %v1130_v47 = vmul.f32 %v2407_v17, %v1123_v9  ;;  %v1133_v10 = vmul.f32 %v2403_v15, %v1123_v9 }
 0x3d5   : > { %v1900_v61 = vpack.i.bf16 %v1124_v5, %v1119_v63  ;;  %v1131_v55 = vmul.f32 %v1119_v63, %v2411_v20  ;;  %v1132_v11 = vmul.f32 %v2405_v16, %v1124_v5  ;;  %v1127_v4 = vmul.f32 %v2381_v3, %v1123_v9 }
 0x3d6   : > { %v1134_v44 = vmul.f32 %v1119_v63, %v2417_v22  ;;  %v1135_v17 = vmul.f32 %v2401_v14, %v1124_v5  ;;  %v1128_v48 = vmul.f32 %v1119_v63, %v2391_v7  ;;  %v1129_v29 = vmul.f32 %v2379_v2, %v1124_v5 }
 0x3d7   : > { %v1915_v50 = vpack.i.bf16 %v1132_v11, %v1131_v55  ;;  %v1136_v3 = vmul.f32 %v2513_v21, %v1123_v9  ;;  %v1137_v20 = vmul.f32 %v1119_v63, %v2523_v27  ;;  %v1138_v14 = vmul.f32 %v2511_v19, %v1124_v5  ;;  %v1314_v19 = vld [vmem:[%s2855_s7] sm:$0xff] }
 0x3d8   : > { %1170 = vrot.lane.b32.xlu0 %v1130_v47, %s2081_s30  ;;  %1901 = vrot.lane.b32.xlu1 %v1900_v61, %s2079_s25  ;;  %v1920_v15 = vpack.i.bf16 %v1135_v17, %v1134_v44  ;;  %v1910_v16 = vpack.i.bf16 %v1129_v29, %v1128_v48  ;;  %v1141_v7 = vmul.f32 %v2433_v31, %v1124_v5  ;;  %v1333_v27 = vld [vmem:[%s2858_s10] sm:$0xff]  ;;  %vm1339_vm5 = vcmask 195584  }
 0x3d9   : > { %v1930_v2 = vpack.i.bf16 %v1138_v14, %v1137_v20  ;;  %v1140_v22 = vmul.f32 %v1119_v63, %v2447_v41  ;;  %v1139_v21 = vmul.f32 %v2435_v38, %v1123_v9  ;;  %v1322_v31 = vld [vmem:[%s2856_s8] sm:$0xff]  ;;  %v1125_v38 = vmul.f32 %v2333_v42, %v1123_v9 }
 0x3da   : > { %v1126_v24 = vmul.f32 %v2336_v43, %v1119_v63 }
 0x3dc   : > { %1193 = vrot.lane.b32.xlu0 %v1133_v10, %s2082_s12  ;;  %1906 = vrot.lane.b32.xlu1 %v1900_v61, %s2078_s23 }
 0x3e0   : > { %1157 = vrot.lane.b32.xlu1 %v1127_v4, %s2080_s14  ;;  %1916 = vrot.lane.b32.xlu0 %v1915_v50, %s2081_s30  ;;  %s2888_s30 = sld [smem:[#allocation14_spill]] }
 0x3e4   : > { %1921 = vrot.lane.b32.xlu0 %v1920_v15, %s2082_s12  ;;  %1911 = vrot.lane.b32.xlu1 %v1910_v16, %s2080_s14 }
 0x3e8   : > { %1926 = vrot.lane.b32.xlu0 %v1900_v61, %s2084_s27  ;;  %1206 = vrot.lane.b32.xlu1 %v1136_v3, %s2886_s13 }
 0x3ec   : > { %1216 = vrot.lane.b32.xlu0 %v1123_v9, %s2084_s27  ;;  %1931 = vrot.lane.b32.xlu1 %v1930_v2, %s2886_s13  ;;  %s432_s13 = scalar_lea.vmem [#allocation7], %s2887_s22 }
 0x3ed   : > { %s1433_s23 = sshll.u32 %s432_s13, 4  ;;  %s2806_s23 = int_to_ptr.vmem [resolvable:$true] %s1433_s23 }
 0x3ee   : > { %s1995_s27 = scalar_lea.vmem %s2806_s23, 256 }
 0x3ef   : > { %p1996_p6 = scmp.ne.s32.totalorder %s2806_s23, %s1995_s27 }
 0x3f0   : > { %1233 = vrot.lane.b32.xlu0 %v1141_v7, %s2085_s11  ;;  %1231 = vrot.lane.b32.xlu1 %v1140_v22, %s2085_s11 }
 0x3f1   : > { %p1997_p8 = pnand %p1996_p6, %p2239_p12 }
 0x3f3   : > { %p1998_p10 = pneg %p1997_p8 }
 0x3f4   : > { %1317 = vperm.xlu0 %1898, %v1314_v19   ;;  %1229 = vrot.lane.b32.xlu1 %v1139_v21, %s2085_s11  ;;  %s2087_s11 = smov [#allocation7]  }
 0x3f5   : > { %s1999_s17 = sshll.u32 %s2087_s11, 4  ;;  %s2000_s17 = int_to_ptr.vmem [resolvable:$false] %s1999_s17 }
 0x3f6   : > { %s2001_s26 = scalar_lea.vmem %s2000_s17, 512  ;;  %p2002_p13 = scmp.lt.s32.totalorder %s2806_s23, %s2000_s17 }
 0x3f7   : > { %p2003_p3 = scmp.lt.s32.totalorder %s2001_s26, %s1995_s27 }
 0x3f8   : > { %1336 = vperm.xlu0 %1898, %v1333_v27   ;;  %1325 = vperm.xlu1 %1899, %v1322_v31  }
 0x3f9   : > { %p2004_p7 = por %p2003_p3, %p2002_p13 }
 0x3fb   : > { %p2005_p9 = pnand %p2004_p7, %p1998_p10 }
 0x446   : > { %v1181_v41 = vpop.permute.xlu1 %1180  ;;  %v1145_v46 = vpop.permute.xlu0 %1144 }
 0x44a   : > { %v1902_v1 = vpop.permute.xlu1 %1901  ;;  %v1171_v58 = vpop.permute.xlu0 %1170 }
 0x44b   : > { %v1904_v13 = vunpack.i.h.bf16 %v1902_v1  ;;  %v1903_v23 = vunpack.i.l.bf16 %v1902_v1  ;;  %v1332_v1 = vld [vmem:[%s2857_s9] sm:$0xff] }
 0x44d   : > { %v1150_v25 = vsel %vm744_vm12, %v1145_v46, %v1903_v23  ;;  %v1151_v26 = vsel %vm744_vm12, %v1903_v23, %v1904_v13  ;;  %v1935_v46 = vld [vmem:[%s2290_s28 + $0x8] sm:$0xff] }
 0x44e   : > { %v1625_v30 = vpack.c.bf16 %v1150_v25, %v1125_v38  ;;  %v1907_v62 = vpop.permute.xlu1 %1906  ;;  %v1194_v53 = vpop.permute.xlu0 %1193  ;;  %v1623_v18 = vpack.c.bf16 %v1151_v26, %v1126_v24 }
 0x44f   : > { %v1909_v56 = vunpack.i.h.bf16 %v1907_v62  ;;  %v1908_v12 = vunpack.i.l.bf16 %v1907_v62 }
 0x450   : > { %1624 = vmatprep.subr.bf16.mxu0 %v1623_v18 }
 0x451   : > { %1626 = vmatpush1.bf16.msra.mxu0 %v1625_v30  ;;  %v1187_v47 = vsel %vm855_vm15, %v1908_v12, %v1909_v56  ;;  %v1186_v44 = vsel %vm855_vm15, %v1181_v41, %v1908_v12  ;;  %v1112_v41 = vld [vmem:[%s2854_s6] sm:$0xff] }
 0x452   : > { %v1158_v51 = vpop.permute.xlu1 %1157  ;;  %v1917_v6 = vpop.permute.xlu0 %1916 }
 0x453   : > { %v1918_v52 = vunpack.i.l.bf16 %v1917_v6  ;;  %v1919_v39 = vunpack.i.h.bf16 %v1917_v6 }
 0x455   : > { %v1176_v60 = vsel %vm824_vm14, %v1171_v58, %v1918_v52  ;;  %v1177_v54 = vsel %vm824_vm14, %v1918_v52, %v1919_v39  ;;  %v1936_v58 = vld [vmem:[%s2290_s28] sm:$0xff]  ;;  %s1554_s28 = sshll.u32 %s2169_s21, 8  ;;  %s1419_s21 = scalar_lea.sflag [#allocation4], %s2284_s24 }
 0x456   : > { %v1912_v40 = vpop.permute.xlu1 %1911  ;;  %v1922_v42 = vpop.permute.xlu0 %1921  ;;  %s2804_s12 = scalar_lea.hbm %s2888_s30, %s1554_s28 }
 0x457   : > { %v1914_v45 = vunpack.i.h.bf16 %v1912_v40  ;;  %v1913_v43 = vunpack.i.l.bf16 %v1912_v40  ;;  %v1924_v28 = vunpack.i.h.bf16 %v1922_v42  ;;  %v1923_v59 = vunpack.i.l.bf16 %v1922_v42 }
 0x459   : > { %v1163_v57 = vsel %vm784_vm13, %v1158_v51, %v1913_v43  ;;  %v1164_v8 = vsel %vm784_vm13, %v1913_v43, %v1914_v45  ;;  %v1200_v9 = vsel %vm895_vm0, %v1923_v59, %v1924_v28  ;;  %v1199_v10 = vsel %vm895_vm0, %v1194_v53, %v1923_v59 }
 0x45a   : > { %v1629_v49 = vpack.c.bf16 %v1176_v60, %v1163_v57  ;;  %v1207_v63 = vpop.permute.xlu1 %1206  ;;  %v1927_v5 = vpop.permute.xlu0 %1926  ;;  %v1627_v61 = vpack.c.bf16 %v1177_v54, %v1164_v8  ;;  %v1631_v55 = vpack.c.bf16 %v1200_v9, %v1187_v47  ;;  %v1633_v48 = vpack.c.bf16 %v1199_v10, %v1186_v44 }
 0x45b   : > { %v1929_v11 = vunpack.i.h.bf16 %v1927_v5  ;;  %v1928_v4 = vunpack.i.l.bf16 %v1927_v5 }
 0x45c   : > { %1628 = vmatprep.subr.bf16.mxu0 %v1627_v61 }
 0x45d   : > { %1630 = vmatpush1.bf16.msra.mxu0 %v1629_v49  ;;  %v1223_v14 = vsel %vm966_vm2, %v1928_v4, %v1929_v11 }
 0x45e   : > { %v1932_v50 = vpop.permute.xlu1 %1931  ;;  %v1217_v17 = vpop.permute.xlu0 %1216  ;;  %1632 = vmatprep.subr.bf16.mxu0 %v1631_v55 }
 0x45f   : > { %v1934_v29 = vunpack.i.h.bf16 %v1932_v50  ;;  %v1933_v15 = vunpack.i.l.bf16 %v1932_v50  ;;  %v1222_v3 = vsel %vm966_vm2, %v1217_v17, %v1928_v4 }
 0x461   : > { %v1212_v16 = vsel %vm935_vm1, %v1207_v63, %v1933_v15  ;;  %1634 = vmatpush1.bf16.msra.mxu0 %v1633_v48  ;;  %v1213_v20 = vsel %vm935_vm1, %v1933_v15, %v1934_v29 }
 0x462   : > { %v1637_v2 = vpack.c.bf16 %v1222_v3, %v1212_v16  ;;  %v1232_v7 = vpop.permute.xlu1 %1231  ;;  %v1234_v22 = vpop.permute.xlu0 %1233  ;;  %v1635_v19 = vpack.c.bf16 %v1223_v14, %v1213_v20 }
 0x463   : > { %v1236_v21 = vsel %vm1006_vm3, %v1232_v7, %v1234_v22 }
 0x464   : > { %1636 = vmatprep.subr.bf16.mxu0 %v1635_v19 }
 0x465   : > { %1638 = vmatpush1.bf16.msra.mxu0 %v1637_v2 }
 0x466   : > { %v1230_v27 = vpop.permute.xlu1 %1229  ;;  %1259 = vmatprep.subr.mxu0 %v1236_v21 }
 0x467   : > { %v1235_v31 = vsel %vm1006_vm3, %v1230_v27, %v1232_v7 }
 0x469   : > { %1260 = vmatpush1.msra.mxu0 %v1235_v31 }
 0x46a   : > { %1545 = vmatmul.mubr.msk.f32.vlgmr.msra.gmra.mrb[4].mxu0 %vm1239_vm4, %v1112_v41  ;;  %1640 = vmatprep.subr.bf16.mxu0 %v1639_v37 }
 0x46b   : > { %1642 = vmatpush1.bf16.msra.mxu0 %v1641_v35  ;;  %1407 = vmatprep.mubr.f32.mxu0 %v2071_v0 }
 0x46c   : > { %1347 = vmatprep.subr.mxu0 %v1935_v46 }
 0x46f   : > { %1348 = vmatpush1.msra.mxu0 %v1936_v58 }
 0x470   : > { %1546 = vmatmul.mubr.msk.f32.vlgmr.msra.gmra.mrb[6].mxu0 %vm1339_vm5, %v1332_v1 }
 0x473   : > { %v1318_v33 = vpop.permute.xlu0 %1317 }
 0x477   : > { %v1326_v32 = vpop.permute.xlu1 %1325  ;;  %v1337_v23 = vpop.permute.xlu0 %1336 }
 0x53d   : > { %v1309_v36 = vpop.f32.mrb[4].mxu0 }
 0x53e   : > { %v1320_v37 = vmul.f32 %v1318_v33, %v1309_v36  ;;  %v1311_v13 = vpop.f32.mrb[5].mxu0 }
 0x53f   : > { %v1321_v34 = vmul.f32 %v1318_v33, %v1311_v13 }
 0x540   : > { %v1328_v35 = vadd.f32 %v1326_v32, %v1320_v37 }
 0x541   : > { %v1329_v0 = vadd.f32 %v1326_v32, %v1321_v34 }
 0x542   : > { %v1330_v24 = vmax.f32 %v1328_v35, 0.0 }
 0x543   : > { %v1409_v38 = vpop.f32.mrb[6].mxu0  ;;  %v1331_v30 = vmax.f32 %v1329_v0, 0.0 }
 0x544   : > { %v1410_v25 = vadd.f32 %v1409_v38, %v1337_v23  ;;  %v1411_v26 = vpop.f32.mrb[7].mxu0 }
 0x545   : > { %v1412_v62 = vadd.f32 %v1411_v26, %v1337_v23 }
 0x546   : > { %v1414_v53 = vadd.f32 %v1410_v25, %v1330_v24 }
 0x547   : > { %v1415_v18 = vadd.f32 %v1412_v62, %v1331_v30 }
 0x548   : > { %1416 = vst [vmem:[%s432_s13] sm:$0xff] %v1414_v53 }
 0x549   : > { %1417 = vst [vmem:[%s432_s13 + $0x8] sm:$0xff] %v1415_v18 }
 0x54a   : > { %2008 = shalt.err (!%p2005_p9)
}
 0x54b   : > { %s2009_s24 = scalar_lea.hbm %s2804_s12, 256  ;;  %s2013_s22 = scalar_lea.hbm %s2888_s30, 512 }
 0x54c   : > { %p2010_p2 = scmp.ne.s32.totalorder %s2804_s12, %s2009_s24  ;;  %p2014_p11 = scmp.lt.u32.totalorder %s2804_s12, %s2888_s30 }
 0x54d   : > { %p2015_p1 = scmp.lt.u32.totalorder %s2013_s22, %s2009_s24  ;;  %p2017_p6 = scmp.lt.u32.totalorder %s2009_s24, %s2804_s12 }
 0x54e   : > { %p2011_p5 = pnand %p2010_p2, %p2239_p12 }
 0x54f   : > { %p2016_p4 = por %p2015_p1, %p2014_p11 }
 0x550   : > { %p2012_p0 = pneg %p2011_p5 }
 0x551   : > { %p2018_p8 = por %p2017_p6, %p2016_p4 }
 0x553   : > { %p2019_p10 = pnand %p2018_p8, %p2012_p0 }
 0x555   : > { %2022 = shalt.err (!%p2019_p10)
}
 0x556   : > { %1649 = dma.vmem_to_hbm [thread:$0]  (%p2239_p12), %s2806_s23, 256, %s2804_s12, %s1419_s21  }
 0x557 PF: > { %s2889_s14 = sld [smem:[#allocation11_spill]]  ;;  %s2890_s27 = sld [smem:[#allocation12_spill]] }
 0x558   : > { %p2892_p3 = scmp.ge.s32.totalorder %s2065_s20, 2 }
 0x55d   : > { %s1445_s11 = sand.u32 1, %s2889_s14   ;;  %p2891_p13 = scmp.ne.s32.totalorder %s2890_s27, 0 }
 0x55e   : > { %s1446_s17 = scalar_lea.sflag [#allocation4], %s1445_s11 }
 0x55f   : > { %p1660_p7 = pnand %p2892_p3, %p2891_p13 }
 0x561   : > { %2048 = dma.done.wait (!%p1660_p7), %s1446_s17, 256  }
 0x562   : > { %2050 = vsyncadd (!%p1660_p7), %s1446_s17, 4294967040  ;;  %s2893_s20 = sld [smem:[#allocation13_spill]]  ;;  %s2894_s17 = smov %s2057_s18 }
 0x563   : > { %s2895_s18 = smov %s2061_s19  ;;  %s2896_s19 = smov %s2235_s29 }
 0x568   : > { %p25_p9 = scmp.ge.s32.totalorder %s2893_s20, 4  }
 0x56a   :  { %27 = sbr.rel (!%p25_p9) target bundleno = 8 (0x8), region = 116 }
 0x571   :  { %1451 = vsyncpa [#allocation3], 1 }
 0x572   :  { %1453 = vsyncpa [#allocation3 + $0x1], 1 }
 0x573   :  { %1454 = vsyncpa [#allocation6], 1 }
 0x574   :  { %1455 = vsyncpa [#allocation4], 1 }
 0x575   :  { %1457 = vsyncpa [#allocation4 + $0x1], 1 }

</bundles_post_ra>
